<compile_context>
chip_gen: v5e
topology: v5e:2x2
jax: 0.10.0
libtpu: 0.0.40
codegen_flags: <defaults>
</compile_context>

<pallas_src>
import jax
import jax.numpy as jnp
from jax.experimental import pallas as pl
from jax.experimental.pallas import tpu as pltpu


# ------------------------------ Pallas kernel ------------------------------ #

def _fused_rnn_kernel(sent_ref,     # SMEM [T] int32      (scalar prefetch)
                      embproj_ref,  # VMEM [V, 4H]        = embedding @ W_ih0
                      whh0_ref,     # VMEM [H, 4H]
                      b0_ref,       # VMEM [1, 4H]        = b_ih0 + b_hh0
                      wih1_ref,     # VMEM [H, 4H]
                      whh1_ref,     # VMEM [H, 4H]
                      b1_ref,       # VMEM [1, 4H]        = b_ih1 + b_hh1
                      fcw_ref,      # VMEM [H, V]
                      fcb_ref,      # VMEM [1, V]
                      out_ref):     # VMEM [T, V]
    T, V = out_ref.shape
    H = whh0_ref.shape[0]

    # ---- embedding lookup + layer-0 input projection as ONE lane-dense matmul ----
    # one_hot(sentence) @ (emb @ W_ih0)  ==  emb[sentence] @ W_ih0
    lane_iota = jax.lax.broadcasted_iota(jnp.int32, (1, V), 1)
    onehot = jnp.concatenate(
        [(lane_iota == sent_ref[t]).astype(jnp.float32) for t in range(T)],
        axis=0)                                                     # [T, V]
    xproj = (jnp.dot(onehot, embproj_ref[...],
                     preferred_element_type=jnp.float32)
             + b0_ref[...])                                         # [T, 4H]

    def lstm_cell(gates, c):
        # Slice first (static lane slices), then only the needed transcendental
        # per gate: sigmoid on i/f/o, tanh on g.  Halves EUP work per cell.
        i = jax.nn.sigmoid(gates[:, 0 * H:1 * H])
        f = jax.nn.sigmoid(gates[:, 1 * H:2 * H])
        g = jnp.tanh(gates[:, 2 * H:3 * H])
        o = jax.nn.sigmoid(gates[:, 3 * H:4 * H])
        c_new = f * c + i * g
        h_new = o * jnp.tanh(c_new)
        return h_new, c_new

    zeros = jnp.zeros((1, H), jnp.float32)

    # ---- layer-0 recurrence (fully unrolled; only h0 @ W_hh0 per step) ----
    h0, c0 = zeros, zeros
    h0s = []
    for t in range(T):
        g0 = xproj[t:t + 1, :] + jnp.dot(
            h0, whh0_ref[...], preferred_element_type=jnp.float32)
        h0, c0 = lstm_cell(g0, c0)
        h0s.append(h0)
    h0_seq = jnp.concatenate(h0s, axis=0)                           # [T, H]

    # ---- hoisted layer-1 input projection (off the serial chain) ----
    x1proj = (jnp.dot(h0_seq, wih1_ref[...],
                      preferred_element_type=jnp.float32)
              + b1_ref[...])                                        # [T, 4H]

    # ---- layer-1 recurrence (only h1 @ W_hh1 per step) ----
    h1, c1 = zeros, zeros
    h1s = []
    for t in range(T):
        g1 = x1proj[t:t + 1, :] + jnp.dot(
            h1, whh1_ref[...], preferred_element_type=jnp.float32)
        h1, c1 = lstm_cell(g1, c1)
        h1s.append(h1)
    hidden = jnp.concatenate(h1s, axis=0)                           # [T, H]

    # ---- fused FC -> ReLU -> LogSoftmax; single lane-dense [T, V] store ----
    logits = (jnp.dot(hidden, fcw_ref[...],
                      preferred_element_type=jnp.float32)
              + fcb_ref[...])
    logits = jnp.maximum(logits, 0.0)                               # F.relu
    m = jnp.max(logits, axis=-1, keepdims=True)
    lse = m + jnp.log(jnp.sum(jnp.exp(logits - m), axis=-1, keepdims=True))
    out_ref[...] = logits - lse                                     # LogSoftmax


# ------------------------------- wrappers ----------------------------------- #

def prepare_kernel_params(raw):
    """Repack raw (PyTorch-layout-equivalent) params into the kernel layout.

    No gate padding: with H=32 the 4H gate axis is exactly one 128-lane tile.
    The embedding table and W_ih0 are folded into a single [V, 4H] table so the
    kernel never touches the raw embedding.
    """
    emb_proj = jnp.dot(raw["embedding"], raw["wih0"])               # [V, 4H]
    return dict(emb_proj=emb_proj,
                whh0=raw["whh0"], b0=raw["b0"],
                wih1=raw["wih1"], whh1=raw["whh1"], b1=raw["b1"],
                fc_w=raw["fc_w"], fc_b=raw["fc_b"])


@jax.jit
def rnn_model_forward(sentence, kp):
    """Forward pass of RNN_model (is_test=False path). Returns [T, V] log-probs."""
    sentence = sentence.reshape(-1).astype(jnp.int32)
    T = sentence.shape[0]
    V, G4 = kp["emb_proj"].shape
    H = kp["whh0"].shape[0]
    Vout = kp["fc_w"].shape[1]

    grid_spec = pltpu.PrefetchScalarGridSpec(
        num_scalar_prefetch=1,
        grid=(1,),
        in_specs=[
            pl.BlockSpec((V, G4), lambda i, s: (0, 0)),    # emb @ W_ih0
            pl.BlockSpec((H, G4), lambda i, s: (0, 0)),    # W_hh0
            pl.BlockSpec((1, G4), lambda i, s: (0, 0)),    # b0
            pl.BlockSpec((H, G4), lambda i, s: (0, 0)),    # W_ih1
            pl.BlockSpec((H, G4), lambda i, s: (0, 0)),    # W_hh1
            pl.BlockSpec((1, G4), lambda i, s: (0, 0)),    # b1
            pl.BlockSpec((H, Vout), lambda i, s: (0, 0)),  # fc_w
            pl.BlockSpec((1, Vout), lambda i, s: (0, 0)),  # fc_b
        ],
        out_specs=pl.BlockSpec((T, Vout), lambda i, s: (0, 0)),
    )
    # TODO(synk): for batched / multi-sentence inference add a leading "parallel"
    # grid axis over sequences so the second TensorCore on v7x is used; batch=1
    # here matches the module's forward.
    return pl.pallas_call(
        _fused_rnn_kernel,
        out_shape=jax.ShapeDtypeStruct((T, Vout), jnp.float32),
        grid_spec=grid_spec,
        compiler_params=pltpu.CompilerParams(
            dimension_semantics=("arbitrary",)),
    )(sentence, kp["emb_proj"], kp["whh0"], kp["b0"],
      kp["wih1"], kp["whh1"], kp["b1"], kp["fc_w"], kp["fc_b"])


# --------------------------- init & pure-JAX reference ---------------------- #

def init_params(key, vocab_len, embedding_dim, lstm_hidden_dim):
    """Deterministic parameter init mirroring the PyTorch module's __init__."""
    ks = jax.random.split(key, 12)
    H, E, V = lstm_hidden_dim, embedding_dim, vocab_len

    embedding = jax.random.uniform(ks[0], (V, E), jnp.float32, -1.0, 1.0)

    k = 1.0 / jnp.sqrt(H)           # nn.LSTM default init

    def u(kk, shape):
        return jax.random.uniform(kk, shape, jnp.float32, -k, k)

    wih0 = u(ks[1], (E, 4 * H))                       # pre-transposed (in, 4H)
    whh0 = u(ks[2], (H, 4 * H))
    b0 = u(ks[3], (1, 4 * H)) + u(ks[4], (1, 4 * H))  # bias_ih + bias_hh
    wih1 = u(ks[5], (H, 4 * H))
    whh1 = u(ks[6], (H, 4 * H))
    b1 = u(ks[7], (1, 4 * H)) + u(ks[8], (1, 4 * H))

    w_bound = jnp.sqrt(6.0 / (H + V))                 # weights_init for fc, bias = 0
    fc_w = jax.random.uniform(ks[9], (H, V), jnp.float32, -w_bound, w_bound)
    fc_b = jnp.zeros((1, V), jnp.float32)

    return dict(embedding=embedding, wih0=wih0, whh0=whh0, b0=b0,
                wih1=wih1, whh1=whh1, b1=b1, fc_w=fc_w, fc_b=fc_b)


def reference_forward(sentence, raw):
    """Pure-JAX reference (raw weights), mirrors the PyTorch forward."""
    x = raw["embedding"][sentence.reshape(-1)]                     # [T, E]
    H = raw["whh0"].shape[0]

    def cell(x_t, h, c, wih, whh, b):
        gates = x_t @ wih + h @ whh + b
        i = jax.nn.sigmoid(gates[:, 0 * H:1 * H])
        f = jax.nn.sigmoid(gates[:, 1 * H:2 * H])
        g = jnp.tanh(gates[:, 2 * H:3 * H])
        o = jax.nn.sigmoid(gates[:, 3 * H:4 * H])
        c = f * c + i * g
        h = o * jnp.tanh(c)
        return h, c

    h0 = c0 = h1 = c1 = jnp.zeros((1, H), jnp.float32)
    outs = []
    for t in range(x.shape[0]):
        h0, c0 = cell(x[t:t + 1], h0, c0, raw["wih0"], raw["whh0"], raw["b0"])
        h1, c1 = cell(h0, h1, c1, raw["wih1"], raw["whh1"], raw["b1"])
        outs.append(h1)
    hid = jnp.concatenate(outs, axis=0)
    logits = jnp.maximum(hid @ raw["fc_w"] + raw["fc_b"], 0.0)
    return jax.nn.log_softmax(logits, axis=-1)


if __name__ == "__main__":
    VOCAB_LEN = 128
    EMBEDDING_DIM = 32
    LSTM_HIDDEN_DIM = 32
    SEQ_LEN = 8

    key = jax.random.PRNGKey(0)
    pkey, skey = jax.random.split(key)
    raw_params = init_params(pkey, VOCAB_LEN, EMBEDDING_DIM, LSTM_HIDDEN_DIM)
    kernel_params = prepare_kernel_params(raw_params)
    sentence = jax.random.randint(skey, (SEQ_LEN,), 0, VOCAB_LEN, dtype=jnp.int32)

    out = rnn_model_forward(sentence, kernel_params)
    out = jax.block_until_ready(out)

    assert out.shape == (SEQ_LEN, VOCAB_LEN)
    assert out.dtype == jnp.float32
    # log-softmax rows must sum to ~1 in prob space
    assert jnp.allclose(jnp.sum(jnp.exp(out), axis=-1), 1.0, atol=1e-4)
    # match the pure-JAX reference
    ref = reference_forward(sentence, raw_params)
    assert jnp.allclose(out, ref, atol=1e-3, rtol=1e-3)

    print("KERNEL_OK")
</pallas_src>

<mosaic_0001>
module attributes {stable_mosaic.version = 11 : i64} {
  func.func @_fused_rnn_kernel(%arg0: i32, %arg1: memref<8xi32, #tpu.memory_space<smem>>, %arg2: memref<128x128xf32, #tpu.memory_space<vmem>>, %arg3: memref<32x128xf32, #tpu.memory_space<vmem>>, %arg4: memref<1x128xf32, #tpu.memory_space<vmem>>, %arg5: memref<32x128xf32, #tpu.memory_space<vmem>>, %arg6: memref<32x128xf32, #tpu.memory_space<vmem>>, %arg7: memref<1x128xf32, #tpu.memory_space<vmem>>, %arg8: memref<32x128xf32, #tpu.memory_space<vmem>>, %arg9: memref<1x128xf32, #tpu.memory_space<vmem>>, %arg10: memref<8x128xf32, #tpu.memory_space<vmem>>) attributes {dimension_semantics = [#tpu.dimension_semantics<arbitrary>], iteration_bounds = array<i64: 1>, scalar_prefetch = 1 : i64, scratch_operands = 0 : i64, tpu.core_type = #tpu.core_type<tc>, window_params = [{pipeline_mode = #tpu.pipeline_mode<synchronous>, transform_indices = @transform_0, window_bounds = array<i64: 128, 128>}, {pipeline_mode = #tpu.pipeline_mode<synchronous>, transform_indices = @transform_1, window_bounds = array<i64: 32, 128>}, {pipeline_mode = #tpu.pipeline_mode<synchronous>, transform_indices = @transform_2, window_bounds = array<i64: 1, 128>}, {pipeline_mode = #tpu.pipeline_mode<synchronous>, transform_indices = @transform_3, window_bounds = array<i64: 32, 128>}, {pipeline_mode = #tpu.pipeline_mode<synchronous>, transform_indices = @transform_4, window_bounds = array<i64: 32, 128>}, {pipeline_mode = #tpu.pipeline_mode<synchronous>, transform_indices = @transform_5, window_bounds = array<i64: 1, 128>}, {pipeline_mode = #tpu.pipeline_mode<synchronous>, transform_indices = @transform_6, window_bounds = array<i64: 32, 128>}, {pipeline_mode = #tpu.pipeline_mode<synchronous>, transform_indices = @transform_7, window_bounds = array<i64: 1, 128>}, {pipeline_mode = #tpu.pipeline_mode<synchronous>, transform_indices = @transform_8, window_bounds = array<i64: 8, 128>}]} {
    %0 = tpu.iota {dimensions = array<i32: 1>} : vector<1x128xi32>
    %c0 = arith.constant 0 : index
    %1 = memref.load %arg1[%c0] : memref<8xi32, #tpu.memory_space<smem>>
    %2 = vector.broadcast %1 : i32 to vector<1x128xi32>
    %3 = arith.cmpi eq, %0, %2 : vector<1x128xi32>
    %4 = arith.extui %3 : vector<1x128xi1> to vector<1x128xi32>
    %5 = arith.sitofp %4 : vector<1x128xi32> to vector<1x128xf32>
    %c1 = arith.constant 1 : index
    %6 = memref.load %arg1[%c1] : memref<8xi32, #tpu.memory_space<smem>>
    %7 = vector.broadcast %6 : i32 to vector<1x128xi32>
    %8 = arith.cmpi eq, %0, %7 : vector<1x128xi32>
    %9 = arith.extui %8 : vector<1x128xi1> to vector<1x128xi32>
    %10 = arith.sitofp %9 : vector<1x128xi32> to vector<1x128xf32>
    %c2 = arith.constant 2 : index
    %11 = memref.load %arg1[%c2] : memref<8xi32, #tpu.memory_space<smem>>
    %12 = vector.broadcast %11 : i32 to vector<1x128xi32>
    %13 = arith.cmpi eq, %0, %12 : vector<1x128xi32>
    %14 = arith.extui %13 : vector<1x128xi1> to vector<1x128xi32>
    %15 = arith.sitofp %14 : vector<1x128xi32> to vector<1x128xf32>
    %c3 = arith.constant 3 : index
    %16 = memref.load %arg1[%c3] : memref<8xi32, #tpu.memory_space<smem>>
    %17 = vector.broadcast %16 : i32 to vector<1x128xi32>
    %18 = arith.cmpi eq, %0, %17 : vector<1x128xi32>
    %19 = arith.extui %18 : vector<1x128xi1> to vector<1x128xi32>
    %20 = arith.sitofp %19 : vector<1x128xi32> to vector<1x128xf32>
    %c4 = arith.constant 4 : index
    %21 = memref.load %arg1[%c4] : memref<8xi32, #tpu.memory_space<smem>>
    %22 = vector.broadcast %21 : i32 to vector<1x128xi32>
    %23 = arith.cmpi eq, %0, %22 : vector<1x128xi32>
    %24 = arith.extui %23 : vector<1x128xi1> to vector<1x128xi32>
    %25 = arith.sitofp %24 : vector<1x128xi32> to vector<1x128xf32>
    %c5 = arith.constant 5 : index
    %26 = memref.load %arg1[%c5] : memref<8xi32, #tpu.memory_space<smem>>
    %27 = vector.broadcast %26 : i32 to vector<1x128xi32>
    %28 = arith.cmpi eq, %0, %27 : vector<1x128xi32>
    %29 = arith.extui %28 : vector<1x128xi1> to vector<1x128xi32>
    %30 = arith.sitofp %29 : vector<1x128xi32> to vector<1x128xf32>
    %c6 = arith.constant 6 : index
    %31 = memref.load %arg1[%c6] : memref<8xi32, #tpu.memory_space<smem>>
    %32 = vector.broadcast %31 : i32 to vector<1x128xi32>
    %33 = arith.cmpi eq, %0, %32 : vector<1x128xi32>
    %34 = arith.extui %33 : vector<1x128xi1> to vector<1x128xi32>
    %35 = arith.sitofp %34 : vector<1x128xi32> to vector<1x128xf32>
    %c7 = arith.constant 7 : index
    %36 = memref.load %arg1[%c7] : memref<8xi32, #tpu.memory_space<smem>>
    %37 = vector.broadcast %36 : i32 to vector<1x128xi32>
    %38 = arith.cmpi eq, %0, %37 : vector<1x128xi32>
    %39 = arith.extui %38 : vector<1x128xi1> to vector<1x128xi32>
    %40 = arith.sitofp %39 : vector<1x128xi32> to vector<1x128xf32>
    %41 = tpu.concatenate %5, %10, %15, %20, %25, %30, %35, %40 in 0 : vector<1x128xf32>, vector<1x128xf32>, vector<1x128xf32>, vector<1x128xf32>, vector<1x128xf32>, vector<1x128xf32>, vector<1x128xf32>, vector<1x128xf32> -> vector<8x128xf32>
    %c0_0 = arith.constant 0 : index
    %c0_1 = arith.constant 0 : index
    %42 = vector.load %arg2[%c0_0, %c0_1] : memref<128x128xf32, #tpu.memory_space<vmem>>, vector<128x128xf32>
    %cst = arith.constant dense<0.000000e+00> : vector<8x128xf32>
    %43 = tpu.matmul %41, %42, %cst {dimension_numbers = #tpu.dot_dimension_numbers<[1], [0], [0], [1], [0, 0, 1, 1], [], []>} : vector<8x128xf32>, vector<128x128xf32>, vector<8x128xf32> -> vector<8x128xf32>
    %c0_2 = arith.constant 0 : index
    %c0_3 = arith.constant 0 : index
    %44 = vector.load %arg4[%c0_2, %c0_3] : memref<1x128xf32, #tpu.memory_space<vmem>>, vector<1x128xf32>
    %45 = vector.broadcast %44 : vector<1x128xf32> to vector<8x128xf32>
    %46 = arith.addf %43, %45 : vector<8x128xf32>
    %cst_4 = arith.constant 0.000000e+00 : f32
    %47 = vector.broadcast %cst_4 : f32 to vector<1x32xf32>
    %48 = vector.extract_strided_slice %46 {offsets = [0, 0], sizes = [1, 128], strides = [1, 1]} : vector<8x128xf32> to vector<1x128xf32>
    %c0_5 = arith.constant 0 : index
    %c0_6 = arith.constant 0 : index
    %49 = vector.load %arg3[%c0_5, %c0_6] : memref<32x128xf32, #tpu.memory_space<vmem>>, vector<32x128xf32>
    %cst_7 = arith.constant dense<0.000000e+00> : vector<1x128xf32>
    %50 = tpu.matmul %47, %49, %cst_7 {dimension_numbers = #tpu.dot_dimension_numbers<[1], [0], [0], [1], [0, 0, 1, 1], [], []>} : vector<1x32xf32>, vector<32x128xf32>, vector<1x128xf32> -> vector<1x128xf32>
    %51 = arith.addf %48, %50 : vector<1x128xf32>
    %52 = vector.extract_strided_slice %51 {offsets = [0, 0], sizes = [1, 32], strides = [1, 1]} : vector<1x128xf32> to vector<1x32xf32>
    %53 = arith.negf %52 : vector<1x32xf32>
    %54 = math.exp %53 : vector<1x32xf32>
    %cst_8 = arith.constant 1.000000e+00 : f32
    %55 = vector.broadcast %cst_8 : f32 to vector<1x32xf32>
    %56 = arith.addf %55, %54 : vector<1x32xf32>
    %57 = arith.divf %55, %56 : vector<1x32xf32>
    %58 = vector.extract_strided_slice %51 {offsets = [0, 32], sizes = [1, 32], strides = [1, 1]} : vector<1x128xf32> to vector<1x32xf32>
    %59 = arith.negf %58 : vector<1x32xf32>
    %60 = math.exp %59 : vector<1x32xf32>
    %cst_9 = arith.constant 1.000000e+00 : f32
    %61 = vector.broadcast %cst_9 : f32 to vector<1x32xf32>
    %62 = arith.addf %61, %60 : vector<1x32xf32>
    %63 = arith.divf %61, %62 : vector<1x32xf32>
    %64 = vector.extract_strided_slice %51 {offsets = [0, 64], sizes = [1, 32], strides = [1, 1]} : vector<1x128xf32> to vector<1x32xf32>
    %65 = math.tanh %64 : vector<1x32xf32>
    %66 = vector.extract_strided_slice %51 {offsets = [0, 96], sizes = [1, 32], strides = [1, 1]} : vector<1x128xf32> to vector<1x32xf32>
    %67 = arith.negf %66 : vector<1x32xf32>
    %68 = math.exp %67 : vector<1x32xf32>
    %cst_10 = arith.constant 1.000000e+00 : f32
    %69 = vector.broadcast %cst_10 : f32 to vector<1x32xf32>
    %70 = arith.addf %69, %68 : vector<1x32xf32>
    %71 = arith.divf %69, %70 : vector<1x32xf32>
    %72 = arith.mulf %63, %47 : vector<1x32xf32>
    %73 = arith.mulf %57, %65 : vector<1x32xf32>
    %74 = arith.addf %72, %73 : vector<1x32xf32>
    %75 = math.tanh %74 : vector<1x32xf32>
    %76 = arith.mulf %71, %75 : vector<1x32xf32>
    %77 = vector.extract_strided_slice %46 {offsets = [1, 0], sizes = [1, 128], strides = [1, 1]} : vector<8x128xf32> to vector<1x128xf32>
    %c0_11 = arith.constant 0 : index
    %c0_12 = arith.constant 0 : index
    %78 = vector.load %arg3[%c0_11, %c0_12] : memref<32x128xf32, #tpu.memory_space<vmem>>, vector<32x128xf32>
    %cst_13 = arith.constant dense<0.000000e+00> : vector<1x128xf32>
    %79 = tpu.matmul %76, %78, %cst_13 {dimension_numbers = #tpu.dot_dimension_numbers<[1], [0], [0], [1], [0, 0, 1, 1], [], []>} : vector<1x32xf32>, vector<32x128xf32>, vector<1x128xf32> -> vector<1x128xf32>
    %80 = arith.addf %77, %79 : vector<1x128xf32>
    %81 = vector.extract_strided_slice %80 {offsets = [0, 0], sizes = [1, 32], strides = [1, 1]} : vector<1x128xf32> to vector<1x32xf32>
    %82 = arith.negf %81 : vector<1x32xf32>
    %83 = math.exp %82 : vector<1x32xf32>
    %cst_14 = arith.constant 1.000000e+00 : f32
    %84 = vector.broadcast %cst_14 : f32 to vector<1x32xf32>
    %85 = arith.addf %84, %83 : vector<1x32xf32>
    %86 = arith.divf %84, %85 : vector<1x32xf32>
    %87 = vector.extract_strided_slice %80 {offsets = [0, 32], sizes = [1, 32], strides = [1, 1]} : vector<1x128xf32> to vector<1x32xf32>
    %88 = arith.negf %87 : vector<1x32xf32>
    %89 = math.exp %88 : vector<1x32xf32>
    %cst_15 = arith.constant 1.000000e+00 : f32
    %90 = vector.broadcast %cst_15 : f32 to vector<1x32xf32>
    %91 = arith.addf %90, %89 : vector<1x32xf32>
    %92 = arith.divf %90, %91 : vector<1x32xf32>
    %93 = vector.extract_strided_slice %80 {offsets = [0, 64], sizes = [1, 32], strides = [1, 1]} : vector<1x128xf32> to vector<1x32xf32>
    %94 = math.tanh %93 : vector<1x32xf32>
    %95 = vector.extract_strided_slice %80 {offsets = [0, 96], sizes = [1, 32], strides = [1, 1]} : vector<1x128xf32> to vector<1x32xf32>
    %96 = arith.negf %95 : vector<1x32xf32>
    %97 = math.exp %96 : vector<1x32xf32>
    %cst_16 = arith.constant 1.000000e+00 : f32
    %98 = vector.broadcast %cst_16 : f32 to vector<1x32xf32>
    %99 = arith.addf %98, %97 : vector<1x32xf32>
    %100 = arith.divf %98, %99 : vector<1x32xf32>
    %101 = arith.mulf %92, %74 : vector<1x32xf32>
    %102 = arith.mulf %86, %94 : vector<1x32xf32>
    %103 = arith.addf %101, %102 : vector<1x32xf32>
    %104 = math.tanh %103 : vector<1x32xf32>
    %105 = arith.mulf %100, %104 : vector<1x32xf32>
    %106 = vector.extract_strided_slice %46 {offsets = [2, 0], sizes = [1, 128], strides = [1, 1]} : vector<8x128xf32> to vector<1x128xf32>
    %c0_17 = arith.constant 0 : index
    %c0_18 = arith.constant 0 : index
    %107 = vector.load %arg3[%c0_17, %c0_18] : memref<32x128xf32, #tpu.memory_space<vmem>>, vector<32x128xf32>
    %cst_19 = arith.constant dense<0.000000e+00> : vector<1x128xf32>
    %108 = tpu.matmul %105, %107, %cst_19 {dimension_numbers = #tpu.dot_dimension_numbers<[1], [0], [0], [1], [0, 0, 1, 1], [], []>} : vector<1x32xf32>, vector<32x128xf32>, vector<1x128xf32> -> vector<1x128xf32>
    %109 = arith.addf %106, %108 : vector<1x128xf32>
    %110 = vector.extract_strided_slice %109 {offsets = [0, 0], sizes = [1, 32], strides = [1, 1]} : vector<1x128xf32> to vector<1x32xf32>
    %111 = arith.negf %110 : vector<1x32xf32>
    %112 = math.exp %111 : vector<1x32xf32>
    %cst_20 = arith.constant 1.000000e+00 : f32
    %113 = vector.broadcast %cst_20 : f32 to vector<1x32xf32>
    %114 = arith.addf %113, %112 : vector<1x32xf32>
    %115 = arith.divf %113, %114 : vector<1x32xf32>
    %116 = vector.extract_strided_slice %109 {offsets = [0, 32], sizes = [1, 32], strides = [1, 1]} : vector<1x128xf32> to vector<1x32xf32>
    %117 = arith.negf %116 : vector<1x32xf32>
    %118 = math.exp %117 : vector<1x32xf32>
    %cst_21 = arith.constant 1.000000e+00 : f32
    %119 = vector.broadcast %cst_21 : f32 to vector<1x32xf32>
    %120 = arith.addf %119, %118 : vector<1x32xf32>
    %121 = arith.divf %119, %120 : vector<1x32xf32>
    %122 = vector.extract_strided_slice %109 {offsets = [0, 64], sizes = [1, 32], strides = [1, 1]} : vector<1x128xf32> to vector<1x32xf32>
    %123 = math.tanh %122 : vector<1x32xf32>
    %124 = vector.extract_strided_slice %109 {offsets = [0, 96], sizes = [1, 32], strides = [1, 1]} : vector<1x128xf32> to vector<1x32xf32>
    %125 = arith.negf %124 : vector<1x32xf32>
    %126 = math.exp %125 : vector<1x32xf32>
    %cst_22 = arith.constant 1.000000e+00 : f32
    %127 = vector.broadcast %cst_22 : f32 to vector<1x32xf32>
    %128 = arith.addf %127, %126 : vector<1x32xf32>
    %129 = arith.divf %127, %128 : vector<1x32xf32>
    %130 = arith.mulf %121, %103 : vector<1x32xf32>
    %131 = arith.mulf %115, %123 : vector<1x32xf32>
    %132 = arith.addf %130, %131 : vector<1x32xf32>
    %133 = math.tanh %132 : vector<1x32xf32>
    %134 = arith.mulf %129, %133 : vector<1x32xf32>
    %135 = vector.extract_strided_slice %46 {offsets = [3, 0], sizes = [1, 128], strides = [1, 1]} : vector<8x128xf32> to vector<1x128xf32>
    %c0_23 = arith.constant 0 : index
    %c0_24 = arith.constant 0 : index
    %136 = vector.load %arg3[%c0_23, %c0_24] : memref<32x128xf32, #tpu.memory_space<vmem>>, vector<32x128xf32>
    %cst_25 = arith.constant dense<0.000000e+00> : vector<1x128xf32>
    %137 = tpu.matmul %134, %136, %cst_25 {dimension_numbers = #tpu.dot_dimension_numbers<[1], [0], [0], [1], [0, 0, 1, 1], [], []>} : vector<1x32xf32>, vector<32x128xf32>, vector<1x128xf32> -> vector<1x128xf32>
    %138 = arith.addf %135, %137 : vector<1x128xf32>
    %139 = vector.extract_strided_slice %138 {offsets = [0, 0], sizes = [1, 32], strides = [1, 1]} : vector<1x128xf32> to vector<1x32xf32>
    %140 = arith.negf %139 : vector<1x32xf32>
    %141 = math.exp %140 : vector<1x32xf32>
    %cst_26 = arith.constant 1.000000e+00 : f32
    %142 = vector.broadcast %cst_26 : f32 to vector<1x32xf32>
    %143 = arith.addf %142, %141 : vector<1x32xf32>
    %144 = arith.divf %142, %143 : vector<1x32xf32>
    %145 = vector.extract_strided_slice %138 {offsets = [0, 32], sizes = [1, 32], strides = [1, 1]} : vector<1x128xf32> to vector<1x32xf32>
    %146 = arith.negf %145 : vector<1x32xf32>
    %147 = math.exp %146 : vector<1x32xf32>
    %cst_27 = arith.constant 1.000000e+00 : f32
    %148 = vector.broadcast %cst_27 : f32 to vector<1x32xf32>
    %149 = arith.addf %148, %147 : vector<1x32xf32>
    %150 = arith.divf %148, %149 : vector<1x32xf32>
    %151 = vector.extract_strided_slice %138 {offsets = [0, 64], sizes = [1, 32], strides = [1, 1]} : vector<1x128xf32> to vector<1x32xf32>
    %152 = math.tanh %151 : vector<1x32xf32>
    %153 = vector.extract_strided_slice %138 {offsets = [0, 96], sizes = [1, 32], strides = [1, 1]} : vector<1x128xf32> to vector<1x32xf32>
    %154 = arith.negf %153 : vector<1x32xf32>
    %155 = math.exp %154 : vector<1x32xf32>
    %cst_28 = arith.constant 1.000000e+00 : f32
    %156 = vector.broadcast %cst_28 : f32 to vector<1x32xf32>
    %157 = arith.addf %156, %155 : vector<1x32xf32>
    %158 = arith.divf %156, %157 : vector<1x32xf32>
    %159 = arith.mulf %150, %132 : vector<1x32xf32>
    %160 = arith.mulf %144, %152 : vector<1x32xf32>
    %161 = arith.addf %159, %160 : vector<1x32xf32>
    %162 = math.tanh %161 : vector<1x32xf32>
    %163 = arith.mulf %158, %162 : vector<1x32xf32>
    %164 = vector.extract_strided_slice %46 {offsets = [4, 0], sizes = [1, 128], strides = [1, 1]} : vector<8x128xf32> to vector<1x128xf32>
    %c0_29 = arith.constant 0 : index
    %c0_30 = arith.constant 0 : index
    %165 = vector.load %arg3[%c0_29, %c0_30] : memref<32x128xf32, #tpu.memory_space<vmem>>, vector<32x128xf32>
    %cst_31 = arith.constant dense<0.000000e+00> : vector<1x128xf32>
    %166 = tpu.matmul %163, %165, %cst_31 {dimension_numbers = #tpu.dot_dimension_numbers<[1], [0], [0], [1], [0, 0, 1, 1], [], []>} : vector<1x32xf32>, vector<32x128xf32>, vector<1x128xf32> -> vector<1x128xf32>
    %167 = arith.addf %164, %166 : vector<1x128xf32>
    %168 = vector.extract_strided_slice %167 {offsets = [0, 0], sizes = [1, 32], strides = [1, 1]} : vector<1x128xf32> to vector<1x32xf32>
    %169 = arith.negf %168 : vector<1x32xf32>
    %170 = math.exp %169 : vector<1x32xf32>
    %cst_32 = arith.constant 1.000000e+00 : f32
    %171 = vector.broadcast %cst_32 : f32 to vector<1x32xf32>
    %172 = arith.addf %171, %170 : vector<1x32xf32>
    %173 = arith.divf %171, %172 : vector<1x32xf32>
    %174 = vector.extract_strided_slice %167 {offsets = [0, 32], sizes = [1, 32], strides = [1, 1]} : vector<1x128xf32> to vector<1x32xf32>
    %175 = arith.negf %174 : vector<1x32xf32>
    %176 = math.exp %175 : vector<1x32xf32>
    %cst_33 = arith.constant 1.000000e+00 : f32
    %177 = vector.broadcast %cst_33 : f32 to vector<1x32xf32>
    %178 = arith.addf %177, %176 : vector<1x32xf32>
    %179 = arith.divf %177, %178 : vector<1x32xf32>
    %180 = vector.extract_strided_slice %167 {offsets = [0, 64], sizes = [1, 32], strides = [1, 1]} : vector<1x128xf32> to vector<1x32xf32>
    %181 = math.tanh %180 : vector<1x32xf32>
    %182 = vector.extract_strided_slice %167 {offsets = [0, 96], sizes = [1, 32], strides = [1, 1]} : vector<1x128xf32> to vector<1x32xf32>
    %183 = arith.negf %182 : vector<1x32xf32>
    %184 = math.exp %183 : vector<1x32xf32>
    %cst_34 = arith.constant 1.000000e+00 : f32
    %185 = vector.broadcast %cst_34 : f32 to vector<1x32xf32>
    %186 = arith.addf %185, %184 : vector<1x32xf32>
    %187 = arith.divf %185, %186 : vector<1x32xf32>
    %188 = arith.mulf %179, %161 : vector<1x32xf32>
    %189 = arith.mulf %173, %181 : vector<1x32xf32>
    %190 = arith.addf %188, %189 : vector<1x32xf32>
    %191 = math.tanh %190 : vector<1x32xf32>
    %192 = arith.mulf %187, %191 : vector<1x32xf32>
    %193 = vector.extract_strided_slice %46 {offsets = [5, 0], sizes = [1, 128], strides = [1, 1]} : vector<8x128xf32> to vector<1x128xf32>
    %c0_35 = arith.constant 0 : index
    %c0_36 = arith.constant 0 : index
    %194 = vector.load %arg3[%c0_35, %c0_36] : memref<32x128xf32, #tpu.memory_space<vmem>>, vector<32x128xf32>
    %cst_37 = arith.constant dense<0.000000e+00> : vector<1x128xf32>
    %195 = tpu.matmul %192, %194, %cst_37 {dimension_numbers = #tpu.dot_dimension_numbers<[1], [0], [0], [1], [0, 0, 1, 1], [], []>} : vector<1x32xf32>, vector<32x128xf32>, vector<1x128xf32> -> vector<1x128xf32>
    %196 = arith.addf %193, %195 : vector<1x128xf32>
    %197 = vector.extract_strided_slice %196 {offsets = [0, 0], sizes = [1, 32], strides = [1, 1]} : vector<1x128xf32> to vector<1x32xf32>
    %198 = arith.negf %197 : vector<1x32xf32>
    %199 = math.exp %198 : vector<1x32xf32>
    %cst_38 = arith.constant 1.000000e+00 : f32
    %200 = vector.broadcast %cst_38 : f32 to vector<1x32xf32>
    %201 = arith.addf %200, %199 : vector<1x32xf32>
    %202 = arith.divf %200, %201 : vector<1x32xf32>
    %203 = vector.extract_strided_slice %196 {offsets = [0, 32], sizes = [1, 32], strides = [1, 1]} : vector<1x128xf32> to vector<1x32xf32>
    %204 = arith.negf %203 : vector<1x32xf32>
    %205 = math.exp %204 : vector<1x32xf32>
    %cst_39 = arith.constant 1.000000e+00 : f32
    %206 = vector.broadcast %cst_39 : f32 to vector<1x32xf32>
    %207 = arith.addf %206, %205 : vector<1x32xf32>
    %208 = arith.divf %206, %207 : vector<1x32xf32>
    %209 = vector.extract_strided_slice %196 {offsets = [0, 64], sizes = [1, 32], strides = [1, 1]} : vector<1x128xf32> to vector<1x32xf32>
    %210 = math.tanh %209 : vector<1x32xf32>
    %211 = vector.extract_strided_slice %196 {offsets = [0, 96], sizes = [1, 32], strides = [1, 1]} : vector<1x128xf32> to vector<1x32xf32>
    %212 = arith.negf %211 : vector<1x32xf32>
    %213 = math.exp %212 : vector<1x32xf32>
    %cst_40 = arith.constant 1.000000e+00 : f32
    %214 = vector.broadcast %cst_40 : f32 to vector<1x32xf32>
    %215 = arith.addf %214, %213 : vector<1x32xf32>
    %216 = arith.divf %214, %215 : vector<1x32xf32>
    %217 = arith.mulf %208, %190 : vector<1x32xf32>
    %218 = arith.mulf %202, %210 : vector<1x32xf32>
    %219 = arith.addf %217, %218 : vector<1x32xf32>
    %220 = math.tanh %219 : vector<1x32xf32>
    %221 = arith.mulf %216, %220 : vector<1x32xf32>
    %222 = vector.extract_strided_slice %46 {offsets = [6, 0], sizes = [1, 128], strides = [1, 1]} : vector<8x128xf32> to vector<1x128xf32>
    %c0_41 = arith.constant 0 : index
    %c0_42 = arith.constant 0 : index
    %223 = vector.load %arg3[%c0_41, %c0_42] : memref<32x128xf32, #tpu.memory_space<vmem>>, vector<32x128xf32>
    %cst_43 = arith.constant dense<0.000000e+00> : vector<1x128xf32>
    %224 = tpu.matmul %221, %223, %cst_43 {dimension_numbers = #tpu.dot_dimension_numbers<[1], [0], [0], [1], [0, 0, 1, 1], [], []>} : vector<1x32xf32>, vector<32x128xf32>, vector<1x128xf32> -> vector<1x128xf32>
    %225 = arith.addf %222, %224 : vector<1x128xf32>
    %226 = vector.extract_strided_slice %225 {offsets = [0, 0], sizes = [1, 32], strides = [1, 1]} : vector<1x128xf32> to vector<1x32xf32>
    %227 = arith.negf %226 : vector<1x32xf32>
    %228 = math.exp %227 : vector<1x32xf32>
    %cst_44 = arith.constant 1.000000e+00 : f32
    %229 = vector.broadcast %cst_44 : f32 to vector<1x32xf32>
    %230 = arith.addf %229, %228 : vector<1x32xf32>
    %231 = arith.divf %229, %230 : vector<1x32xf32>
    %232 = vector.extract_strided_slice %225 {offsets = [0, 32], sizes = [1, 32], strides = [1, 1]} : vector<1x128xf32> to vector<1x32xf32>
    %233 = arith.negf %232 : vector<1x32xf32>
    %234 = math.exp %233 : vector<1x32xf32>
    %cst_45 = arith.constant 1.000000e+00 : f32
    %235 = vector.broadcast %cst_45 : f32 to vector<1x32xf32>
    %236 = arith.addf %235, %234 : vector<1x32xf32>
    %237 = arith.divf %235, %236 : vector<1x32xf32>
    %238 = vector.extract_strided_slice %225 {offsets = [0, 64], sizes = [1, 32], strides = [1, 1]} : vector<1x128xf32> to vector<1x32xf32>
    %239 = math.tanh %238 : vector<1x32xf32>
    %240 = vector.extract_strided_slice %225 {offsets = [0, 96], sizes = [1, 32], strides = [1, 1]} : vector<1x128xf32> to vector<1x32xf32>
    %241 = arith.negf %240 : vector<1x32xf32>
    %242 = math.exp %241 : vector<1x32xf32>
    %cst_46 = arith.constant 1.000000e+00 : f32
    %243 = vector.broadcast %cst_46 : f32 to vector<1x32xf32>
    %244 = arith.addf %243, %242 : vector<1x32xf32>
    %245 = arith.divf %243, %244 : vector<1x32xf32>
    %246 = arith.mulf %237, %219 : vector<1x32xf32>
    %247 = arith.mulf %231, %239 : vector<1x32xf32>
    %248 = arith.addf %246, %247 : vector<1x32xf32>
    %249 = math.tanh %248 : vector<1x32xf32>
    %250 = arith.mulf %245, %249 : vector<1x32xf32>
    %251 = vector.extract_strided_slice %46 {offsets = [7, 0], sizes = [1, 128], strides = [1, 1]} : vector<8x128xf32> to vector<1x128xf32>
    %c0_47 = arith.constant 0 : index
    %c0_48 = arith.constant 0 : index
    %252 = vector.load %arg3[%c0_47, %c0_48] : memref<32x128xf32, #tpu.memory_space<vmem>>, vector<32x128xf32>
    %cst_49 = arith.constant dense<0.000000e+00> : vector<1x128xf32>
    %253 = tpu.matmul %250, %252, %cst_49 {dimension_numbers = #tpu.dot_dimension_numbers<[1], [0], [0], [1], [0, 0, 1, 1], [], []>} : vector<1x32xf32>, vector<32x128xf32>, vector<1x128xf32> -> vector<1x128xf32>
    %254 = arith.addf %251, %253 : vector<1x128xf32>
    %255 = vector.extract_strided_slice %254 {offsets = [0, 0], sizes = [1, 32], strides = [1, 1]} : vector<1x128xf32> to vector<1x32xf32>
    %256 = arith.negf %255 : vector<1x32xf32>
    %257 = math.exp %256 : vector<1x32xf32>
    %cst_50 = arith.constant 1.000000e+00 : f32
    %258 = vector.broadcast %cst_50 : f32 to vector<1x32xf32>
    %259 = arith.addf %258, %257 : vector<1x32xf32>
    %260 = arith.divf %258, %259 : vector<1x32xf32>
    %261 = vector.extract_strided_slice %254 {offsets = [0, 32], sizes = [1, 32], strides = [1, 1]} : vector<1x128xf32> to vector<1x32xf32>
    %262 = arith.negf %261 : vector<1x32xf32>
    %263 = math.exp %262 : vector<1x32xf32>
    %cst_51 = arith.constant 1.000000e+00 : f32
    %264 = vector.broadcast %cst_51 : f32 to vector<1x32xf32>
    %265 = arith.addf %264, %263 : vector<1x32xf32>
    %266 = arith.divf %264, %265 : vector<1x32xf32>
    %267 = vector.extract_strided_slice %254 {offsets = [0, 64], sizes = [1, 32], strides = [1, 1]} : vector<1x128xf32> to vector<1x32xf32>
    %268 = math.tanh %267 : vector<1x32xf32>
    %269 = vector.extract_strided_slice %254 {offsets = [0, 96], sizes = [1, 32], strides = [1, 1]} : vector<1x128xf32> to vector<1x32xf32>
    %270 = arith.negf %269 : vector<1x32xf32>
    %271 = math.exp %270 : vector<1x32xf32>
    %cst_52 = arith.constant 1.000000e+00 : f32
    %272 = vector.broadcast %cst_52 : f32 to vector<1x32xf32>
    %273 = arith.addf %272, %271 : vector<1x32xf32>
    %274 = arith.divf %272, %273 : vector<1x32xf32>
    %275 = arith.mulf %266, %248 : vector<1x32xf32>
    %276 = arith.mulf %260, %268 : vector<1x32xf32>
    %277 = arith.addf %275, %276 : vector<1x32xf32>
    %278 = math.tanh %277 : vector<1x32xf32>
    %279 = arith.mulf %274, %278 : vector<1x32xf32>
    %280 = tpu.concatenate %76, %105, %134, %163, %192, %221, %250, %279 in 0 : vector<1x32xf32>, vector<1x32xf32>, vector<1x32xf32>, vector<1x32xf32>, vector<1x32xf32>, vector<1x32xf32>, vector<1x32xf32>, vector<1x32xf32> -> vector<8x32xf32>
    %c0_53 = arith.constant 0 : index
    %c0_54 = arith.constant 0 : index
    %281 = vector.load %arg5[%c0_53, %c0_54] : memref<32x128xf32, #tpu.memory_space<vmem>>, vector<32x128xf32>
    %cst_55 = arith.constant dense<0.000000e+00> : vector<8x128xf32>
    %282 = tpu.matmul %280, %281, %cst_55 {dimension_numbers = #tpu.dot_dimension_numbers<[1], [0], [0], [1], [0, 0, 1, 1], [], []>} : vector<8x32xf32>, vector<32x128xf32>, vector<8x128xf32> -> vector<8x128xf32>
    %c0_56 = arith.constant 0 : index
    %c0_57 = arith.constant 0 : index
    %283 = vector.load %arg7[%c0_56, %c0_57] : memref<1x128xf32, #tpu.memory_space<vmem>>, vector<1x128xf32>
    %284 = vector.broadcast %283 : vector<1x128xf32> to vector<8x128xf32>
    %285 = arith.addf %282, %284 : vector<8x128xf32>
    %286 = vector.extract_strided_slice %285 {offsets = [0, 0], sizes = [1, 128], strides = [1, 1]} : vector<8x128xf32> to vector<1x128xf32>
    %c0_58 = arith.constant 0 : index
    %c0_59 = arith.constant 0 : index
    %287 = vector.load %arg6[%c0_58, %c0_59] : memref<32x128xf32, #tpu.memory_space<vmem>>, vector<32x128xf32>
    %cst_60 = arith.constant dense<0.000000e+00> : vector<1x128xf32>
    %288 = tpu.matmul %47, %287, %cst_60 {dimension_numbers = #tpu.dot_dimension_numbers<[1], [0], [0], [1], [0, 0, 1, 1], [], []>} : vector<1x32xf32>, vector<32x128xf32>, vector<1x128xf32> -> vector<1x128xf32>
    %289 = arith.addf %286, %288 : vector<1x128xf32>
    %290 = vector.extract_strided_slice %289 {offsets = [0, 0], sizes = [1, 32], strides = [1, 1]} : vector<1x128xf32> to vector<1x32xf32>
    %291 = arith.negf %290 : vector<1x32xf32>
    %292 = math.exp %291 : vector<1x32xf32>
    %cst_61 = arith.constant 1.000000e+00 : f32
    %293 = vector.broadcast %cst_61 : f32 to vector<1x32xf32>
    %294 = arith.addf %293, %292 : vector<1x32xf32>
    %295 = arith.divf %293, %294 : vector<1x32xf32>
    %296 = vector.extract_strided_slice %289 {offsets = [0, 32], sizes = [1, 32], strides = [1, 1]} : vector<1x128xf32> to vector<1x32xf32>
    %297 = arith.negf %296 : vector<1x32xf32>
    %298 = math.exp %297 : vector<1x32xf32>
    %cst_62 = arith.constant 1.000000e+00 : f32
    %299 = vector.broadcast %cst_62 : f32 to vector<1x32xf32>
    %300 = arith.addf %299, %298 : vector<1x32xf32>
    %301 = arith.divf %299, %300 : vector<1x32xf32>
    %302 = vector.extract_strided_slice %289 {offsets = [0, 64], sizes = [1, 32], strides = [1, 1]} : vector<1x128xf32> to vector<1x32xf32>
    %303 = math.tanh %302 : vector<1x32xf32>
    %304 = vector.extract_strided_slice %289 {offsets = [0, 96], sizes = [1, 32], strides = [1, 1]} : vector<1x128xf32> to vector<1x32xf32>
    %305 = arith.negf %304 : vector<1x32xf32>
    %306 = math.exp %305 : vector<1x32xf32>
    %cst_63 = arith.constant 1.000000e+00 : f32
    %307 = vector.broadcast %cst_63 : f32 to vector<1x32xf32>
    %308 = arith.addf %307, %306 : vector<1x32xf32>
    %309 = arith.divf %307, %308 : vector<1x32xf32>
    %310 = arith.mulf %301, %47 : vector<1x32xf32>
    %311 = arith.mulf %295, %303 : vector<1x32xf32>
    %312 = arith.addf %310, %311 : vector<1x32xf32>
    %313 = math.tanh %312 : vector<1x32xf32>
    %314 = arith.mulf %309, %313 : vector<1x32xf32>
    %315 = vector.extract_strided_slice %285 {offsets = [1, 0], sizes = [1, 128], strides = [1, 1]} : vector<8x128xf32> to vector<1x128xf32>
    %c0_64 = arith.constant 0 : index
    %c0_65 = arith.constant 0 : index
    %316 = vector.load %arg6[%c0_64, %c0_65] : memref<32x128xf32, #tpu.memory_space<vmem>>, vector<32x128xf32>
    %cst_66 = arith.constant dense<0.000000e+00> : vector<1x128xf32>
    %317 = tpu.matmul %314, %316, %cst_66 {dimension_numbers = #tpu.dot_dimension_numbers<[1], [0], [0], [1], [0, 0, 1, 1], [], []>} : vector<1x32xf32>, vector<32x128xf32>, vector<1x128xf32> -> vector<1x128xf32>
    %318 = arith.addf %315, %317 : vector<1x128xf32>
    %319 = vector.extract_strided_slice %318 {offsets = [0, 0], sizes = [1, 32], strides = [1, 1]} : vector<1x128xf32> to vector<1x32xf32>
    %320 = arith.negf %319 : vector<1x32xf32>
    %321 = math.exp %320 : vector<1x32xf32>
    %cst_67 = arith.constant 1.000000e+00 : f32
    %322 = vector.broadcast %cst_67 : f32 to vector<1x32xf32>
    %323 = arith.addf %322, %321 : vector<1x32xf32>
    %324 = arith.divf %322, %323 : vector<1x32xf32>
    %325 = vector.extract_strided_slice %318 {offsets = [0, 32], sizes = [1, 32], strides = [1, 1]} : vector<1x128xf32> to vector<1x32xf32>
    %326 = arith.negf %325 : vector<1x32xf32>
    %327 = math.exp %326 : vector<1x32xf32>
    %cst_68 = arith.constant 1.000000e+00 : f32
    %328 = vector.broadcast %cst_68 : f32 to vector<1x32xf32>
    %329 = arith.addf %328, %327 : vector<1x32xf32>
    %330 = arith.divf %328, %329 : vector<1x32xf32>
    %331 = vector.extract_strided_slice %318 {offsets = [0, 64], sizes = [1, 32], strides = [1, 1]} : vector<1x128xf32> to vector<1x32xf32>
    %332 = math.tanh %331 : vector<1x32xf32>
    %333 = vector.extract_strided_slice %318 {offsets = [0, 96], sizes = [1, 32], strides = [1, 1]} : vector<1x128xf32> to vector<1x32xf32>
    %334 = arith.negf %333 : vector<1x32xf32>
    %335 = math.exp %334 : vector<1x32xf32>
    %cst_69 = arith.constant 1.000000e+00 : f32
    %336 = vector.broadcast %cst_69 : f32 to vector<1x32xf32>
    %337 = arith.addf %336, %335 : vector<1x32xf32>
    %338 = arith.divf %336, %337 : vector<1x32xf32>
    %339 = arith.mulf %330, %312 : vector<1x32xf32>
    %340 = arith.mulf %324, %332 : vector<1x32xf32>
    %341 = arith.addf %339, %340 : vector<1x32xf32>
    %342 = math.tanh %341 : vector<1x32xf32>
    %343 = arith.mulf %338, %342 : vector<1x32xf32>
    %344 = vector.extract_strided_slice %285 {offsets = [2, 0], sizes = [1, 128], strides = [1, 1]} : vector<8x128xf32> to vector<1x128xf32>
    %c0_70 = arith.constant 0 : index
    %c0_71 = arith.constant 0 : index
    %345 = vector.load %arg6[%c0_70, %c0_71] : memref<32x128xf32, #tpu.memory_space<vmem>>, vector<32x128xf32>
    %cst_72 = arith.constant dense<0.000000e+00> : vector<1x128xf32>
    %346 = tpu.matmul %343, %345, %cst_72 {dimension_numbers = #tpu.dot_dimension_numbers<[1], [0], [0], [1], [0, 0, 1, 1], [], []>} : vector<1x32xf32>, vector<32x128xf32>, vector<1x128xf32> -> vector<1x128xf32>
    %347 = arith.addf %344, %346 : vector<1x128xf32>
    %348 = vector.extract_strided_slice %347 {offsets = [0, 0], sizes = [1, 32], strides = [1, 1]} : vector<1x128xf32> to vector<1x32xf32>
    %349 = arith.negf %348 : vector<1x32xf32>
    %350 = math.exp %349 : vector<1x32xf32>
    %cst_73 = arith.constant 1.000000e+00 : f32
    %351 = vector.broadcast %cst_73 : f32 to vector<1x32xf32>
    %352 = arith.addf %351, %350 : vector<1x32xf32>
    %353 = arith.divf %351, %352 : vector<1x32xf32>
    %354 = vector.extract_strided_slice %347 {offsets = [0, 32], sizes = [1, 32], strides = [1, 1]} : vector<1x128xf32> to vector<1x32xf32>
    %355 = arith.negf %354 : vector<1x32xf32>
    %356 = math.exp %355 : vector<1x32xf32>
    %cst_74 = arith.constant 1.000000e+00 : f32
    %357 = vector.broadcast %cst_74 : f32 to vector<1x32xf32>
    %358 = arith.addf %357, %356 : vector<1x32xf32>
    %359 = arith.divf %357, %358 : vector<1x32xf32>
    %360 = vector.extract_strided_slice %347 {offsets = [0, 64], sizes = [1, 32], strides = [1, 1]} : vector<1x128xf32> to vector<1x32xf32>
    %361 = math.tanh %360 : vector<1x32xf32>
    %362 = vector.extract_strided_slice %347 {offsets = [0, 96], sizes = [1, 32], strides = [1, 1]} : vector<1x128xf32> to vector<1x32xf32>
    %363 = arith.negf %362 : vector<1x32xf32>
    %364 = math.exp %363 : vector<1x32xf32>
    %cst_75 = arith.constant 1.000000e+00 : f32
    %365 = vector.broadcast %cst_75 : f32 to vector<1x32xf32>
    %366 = arith.addf %365, %364 : vector<1x32xf32>
    %367 = arith.divf %365, %366 : vector<1x32xf32>
    %368 = arith.mulf %359, %341 : vector<1x32xf32>
    %369 = arith.mulf %353, %361 : vector<1x32xf32>
    %370 = arith.addf %368, %369 : vector<1x32xf32>
    %371 = math.tanh %370 : vector<1x32xf32>
    %372 = arith.mulf %367, %371 : vector<1x32xf32>
    %373 = vector.extract_strided_slice %285 {offsets = [3, 0], sizes = [1, 128], strides = [1, 1]} : vector<8x128xf32> to vector<1x128xf32>
    %c0_76 = arith.constant 0 : index
    %c0_77 = arith.constant 0 : index
    %374 = vector.load %arg6[%c0_76, %c0_77] : memref<32x128xf32, #tpu.memory_space<vmem>>, vector<32x128xf32>
    %cst_78 = arith.constant dense<0.000000e+00> : vector<1x128xf32>
    %375 = tpu.matmul %372, %374, %cst_78 {dimension_numbers = #tpu.dot_dimension_numbers<[1], [0], [0], [1], [0, 0, 1, 1], [], []>} : vector<1x32xf32>, vector<32x128xf32>, vector<1x128xf32> -> vector<1x128xf32>
    %376 = arith.addf %373, %375 : vector<1x128xf32>
    %377 = vector.extract_strided_slice %376 {offsets = [0, 0], sizes = [1, 32], strides = [1, 1]} : vector<1x128xf32> to vector<1x32xf32>
    %378 = arith.negf %377 : vector<1x32xf32>
    %379 = math.exp %378 : vector<1x32xf32>
    %cst_79 = arith.constant 1.000000e+00 : f32
    %380 = vector.broadcast %cst_79 : f32 to vector<1x32xf32>
    %381 = arith.addf %380, %379 : vector<1x32xf32>
    %382 = arith.divf %380, %381 : vector<1x32xf32>
    %383 = vector.extract_strided_slice %376 {offsets = [0, 32], sizes = [1, 32], strides = [1, 1]} : vector<1x128xf32> to vector<1x32xf32>
    %384 = arith.negf %383 : vector<1x32xf32>
    %385 = math.exp %384 : vector<1x32xf32>
    %cst_80 = arith.constant 1.000000e+00 : f32
    %386 = vector.broadcast %cst_80 : f32 to vector<1x32xf32>
    %387 = arith.addf %386, %385 : vector<1x32xf32>
    %388 = arith.divf %386, %387 : vector<1x32xf32>
    %389 = vector.extract_strided_slice %376 {offsets = [0, 64], sizes = [1, 32], strides = [1, 1]} : vector<1x128xf32> to vector<1x32xf32>
    %390 = math.tanh %389 : vector<1x32xf32>
    %391 = vector.extract_strided_slice %376 {offsets = [0, 96], sizes = [1, 32], strides = [1, 1]} : vector<1x128xf32> to vector<1x32xf32>
    %392 = arith.negf %391 : vector<1x32xf32>
    %393 = math.exp %392 : vector<1x32xf32>
    %cst_81 = arith.constant 1.000000e+00 : f32
    %394 = vector.broadcast %cst_81 : f32 to vector<1x32xf32>
    %395 = arith.addf %394, %393 : vector<1x32xf32>
    %396 = arith.divf %394, %395 : vector<1x32xf32>
    %397 = arith.mulf %388, %370 : vector<1x32xf32>
    %398 = arith.mulf %382, %390 : vector<1x32xf32>
    %399 = arith.addf %397, %398 : vector<1x32xf32>
    %400 = math.tanh %399 : vector<1x32xf32>
    %401 = arith.mulf %396, %400 : vector<1x32xf32>
    %402 = vector.extract_strided_slice %285 {offsets = [4, 0], sizes = [1, 128], strides = [1, 1]} : vector<8x128xf32> to vector<1x128xf32>
    %c0_82 = arith.constant 0 : index
    %c0_83 = arith.constant 0 : index
    %403 = vector.load %arg6[%c0_82, %c0_83] : memref<32x128xf32, #tpu.memory_space<vmem>>, vector<32x128xf32>
    %cst_84 = arith.constant dense<0.000000e+00> : vector<1x128xf32>
    %404 = tpu.matmul %401, %403, %cst_84 {dimension_numbers = #tpu.dot_dimension_numbers<[1], [0], [0], [1], [0, 0, 1, 1], [], []>} : vector<1x32xf32>, vector<32x128xf32>, vector<1x128xf32> -> vector<1x128xf32>
    %405 = arith.addf %402, %404 : vector<1x128xf32>
    %406 = vector.extract_strided_slice %405 {offsets = [0, 0], sizes = [1, 32], strides = [1, 1]} : vector<1x128xf32> to vector<1x32xf32>
    %407 = arith.negf %406 : vector<1x32xf32>
    %408 = math.exp %407 : vector<1x32xf32>
    %cst_85 = arith.constant 1.000000e+00 : f32
    %409 = vector.broadcast %cst_85 : f32 to vector<1x32xf32>
    %410 = arith.addf %409, %408 : vector<1x32xf32>
    %411 = arith.divf %409, %410 : vector<1x32xf32>
    %412 = vector.extract_strided_slice %405 {offsets = [0, 32], sizes = [1, 32], strides = [1, 1]} : vector<1x128xf32> to vector<1x32xf32>
    %413 = arith.negf %412 : vector<1x32xf32>
    %414 = math.exp %413 : vector<1x32xf32>
    %cst_86 = arith.constant 1.000000e+00 : f32
    %415 = vector.broadcast %cst_86 : f32 to vector<1x32xf32>
    %416 = arith.addf %415, %414 : vector<1x32xf32>
    %417 = arith.divf %415, %416 : vector<1x32xf32>
    %418 = vector.extract_strided_slice %405 {offsets = [0, 64], sizes = [1, 32], strides = [1, 1]} : vector<1x128xf32> to vector<1x32xf32>
    %419 = math.tanh %418 : vector<1x32xf32>
    %420 = vector.extract_strided_slice %405 {offsets = [0, 96], sizes = [1, 32], strides = [1, 1]} : vector<1x128xf32> to vector<1x32xf32>
    %421 = arith.negf %420 : vector<1x32xf32>
    %422 = math.exp %421 : vector<1x32xf32>
    %cst_87 = arith.constant 1.000000e+00 : f32
    %423 = vector.broadcast %cst_87 : f32 to vector<1x32xf32>
    %424 = arith.addf %423, %422 : vector<1x32xf32>
    %425 = arith.divf %423, %424 : vector<1x32xf32>
    %426 = arith.mulf %417, %399 : vector<1x32xf32>
    %427 = arith.mulf %411, %419 : vector<1x32xf32>
    %428 = arith.addf %426, %427 : vector<1x32xf32>
    %429 = math.tanh %428 : vector<1x32xf32>
    %430 = arith.mulf %425, %429 : vector<1x32xf32>
    %431 = vector.extract_strided_slice %285 {offsets = [5, 0], sizes = [1, 128], strides = [1, 1]} : vector<8x128xf32> to vector<1x128xf32>
    %c0_88 = arith.constant 0 : index
    %c0_89 = arith.constant 0 : index
    %432 = vector.load %arg6[%c0_88, %c0_89] : memref<32x128xf32, #tpu.memory_space<vmem>>, vector<32x128xf32>
    %cst_90 = arith.constant dense<0.000000e+00> : vector<1x128xf32>
    %433 = tpu.matmul %430, %432, %cst_90 {dimension_numbers = #tpu.dot_dimension_numbers<[1], [0], [0], [1], [0, 0, 1, 1], [], []>} : vector<1x32xf32>, vector<32x128xf32>, vector<1x128xf32> -> vector<1x128xf32>
    %434 = arith.addf %431, %433 : vector<1x128xf32>
    %435 = vector.extract_strided_slice %434 {offsets = [0, 0], sizes = [1, 32], strides = [1, 1]} : vector<1x128xf32> to vector<1x32xf32>
    %436 = arith.negf %435 : vector<1x32xf32>
    %437 = math.exp %436 : vector<1x32xf32>
    %cst_91 = arith.constant 1.000000e+00 : f32
    %438 = vector.broadcast %cst_91 : f32 to vector<1x32xf32>
    %439 = arith.addf %438, %437 : vector<1x32xf32>
    %440 = arith.divf %438, %439 : vector<1x32xf32>
    %441 = vector.extract_strided_slice %434 {offsets = [0, 32], sizes = [1, 32], strides = [1, 1]} : vector<1x128xf32> to vector<1x32xf32>
    %442 = arith.negf %441 : vector<1x32xf32>
    %443 = math.exp %442 : vector<1x32xf32>
    %cst_92 = arith.constant 1.000000e+00 : f32
    %444 = vector.broadcast %cst_92 : f32 to vector<1x32xf32>
    %445 = arith.addf %444, %443 : vector<1x32xf32>
    %446 = arith.divf %444, %445 : vector<1x32xf32>
    %447 = vector.extract_strided_slice %434 {offsets = [0, 64], sizes = [1, 32], strides = [1, 1]} : vector<1x128xf32> to vector<1x32xf32>
    %448 = math.tanh %447 : vector<1x32xf32>
    %449 = vector.extract_strided_slice %434 {offsets = [0, 96], sizes = [1, 32], strides = [1, 1]} : vector<1x128xf32> to vector<1x32xf32>
    %450 = arith.negf %449 : vector<1x32xf32>
    %451 = math.exp %450 : vector<1x32xf32>
    %cst_93 = arith.constant 1.000000e+00 : f32
    %452 = vector.broadcast %cst_93 : f32 to vector<1x32xf32>
    %453 = arith.addf %452, %451 : vector<1x32xf32>
    %454 = arith.divf %452, %453 : vector<1x32xf32>
    %455 = arith.mulf %446, %428 : vector<1x32xf32>
    %456 = arith.mulf %440, %448 : vector<1x32xf32>
    %457 = arith.addf %455, %456 : vector<1x32xf32>
    %458 = math.tanh %457 : vector<1x32xf32>
    %459 = arith.mulf %454, %458 : vector<1x32xf32>
    %460 = vector.extract_strided_slice %285 {offsets = [6, 0], sizes = [1, 128], strides = [1, 1]} : vector<8x128xf32> to vector<1x128xf32>
    %c0_94 = arith.constant 0 : index
    %c0_95 = arith.constant 0 : index
    %461 = vector.load %arg6[%c0_94, %c0_95] : memref<32x128xf32, #tpu.memory_space<vmem>>, vector<32x128xf32>
    %cst_96 = arith.constant dense<0.000000e+00> : vector<1x128xf32>
    %462 = tpu.matmul %459, %461, %cst_96 {dimension_numbers = #tpu.dot_dimension_numbers<[1], [0], [0], [1], [0, 0, 1, 1], [], []>} : vector<1x32xf32>, vector<32x128xf32>, vector<1x128xf32> -> vector<1x128xf32>
    %463 = arith.addf %460, %462 : vector<1x128xf32>
    %464 = vector.extract_strided_slice %463 {offsets = [0, 0], sizes = [1, 32], strides = [1, 1]} : vector<1x128xf32> to vector<1x32xf32>
    %465 = arith.negf %464 : vector<1x32xf32>
    %466 = math.exp %465 : vector<1x32xf32>
    %cst_97 = arith.constant 1.000000e+00 : f32
    %467 = vector.broadcast %cst_97 : f32 to vector<1x32xf32>
    %468 = arith.addf %467, %466 : vector<1x32xf32>
    %469 = arith.divf %467, %468 : vector<1x32xf32>
    %470 = vector.extract_strided_slice %463 {offsets = [0, 32], sizes = [1, 32], strides = [1, 1]} : vector<1x128xf32> to vector<1x32xf32>
    %471 = arith.negf %470 : vector<1x32xf32>
    %472 = math.exp %471 : vector<1x32xf32>
    %cst_98 = arith.constant 1.000000e+00 : f32
    %473 = vector.broadcast %cst_98 : f32 to vector<1x32xf32>
    %474 = arith.addf %473, %472 : vector<1x32xf32>
    %475 = arith.divf %473, %474 : vector<1x32xf32>
    %476 = vector.extract_strided_slice %463 {offsets = [0, 64], sizes = [1, 32], strides = [1, 1]} : vector<1x128xf32> to vector<1x32xf32>
    %477 = math.tanh %476 : vector<1x32xf32>
    %478 = vector.extract_strided_slice %463 {offsets = [0, 96], sizes = [1, 32], strides = [1, 1]} : vector<1x128xf32> to vector<1x32xf32>
    %479 = arith.negf %478 : vector<1x32xf32>
    %480 = math.exp %479 : vector<1x32xf32>
    %cst_99 = arith.constant 1.000000e+00 : f32
    %481 = vector.broadcast %cst_99 : f32 to vector<1x32xf32>
    %482 = arith.addf %481, %480 : vector<1x32xf32>
    %483 = arith.divf %481, %482 : vector<1x32xf32>
    %484 = arith.mulf %475, %457 : vector<1x32xf32>
    %485 = arith.mulf %469, %477 : vector<1x32xf32>
    %486 = arith.addf %484, %485 : vector<1x32xf32>
    %487 = math.tanh %486 : vector<1x32xf32>
    %488 = arith.mulf %483, %487 : vector<1x32xf32>
    %489 = vector.extract_strided_slice %285 {offsets = [7, 0], sizes = [1, 128], strides = [1, 1]} : vector<8x128xf32> to vector<1x128xf32>
    %c0_100 = arith.constant 0 : index
    %c0_101 = arith.constant 0 : index
    %490 = vector.load %arg6[%c0_100, %c0_101] : memref<32x128xf32, #tpu.memory_space<vmem>>, vector<32x128xf32>
    %cst_102 = arith.constant dense<0.000000e+00> : vector<1x128xf32>
    %491 = tpu.matmul %488, %490, %cst_102 {dimension_numbers = #tpu.dot_dimension_numbers<[1], [0], [0], [1], [0, 0, 1, 1], [], []>} : vector<1x32xf32>, vector<32x128xf32>, vector<1x128xf32> -> vector<1x128xf32>
    %492 = arith.addf %489, %491 : vector<1x128xf32>
    %493 = vector.extract_strided_slice %492 {offsets = [0, 0], sizes = [1, 32], strides = [1, 1]} : vector<1x128xf32> to vector<1x32xf32>
    %494 = arith.negf %493 : vector<1x32xf32>
    %495 = math.exp %494 : vector<1x32xf32>
    %cst_103 = arith.constant 1.000000e+00 : f32
    %496 = vector.broadcast %cst_103 : f32 to vector<1x32xf32>
    %497 = arith.addf %496, %495 : vector<1x32xf32>
    %498 = arith.divf %496, %497 : vector<1x32xf32>
    %499 = vector.extract_strided_slice %492 {offsets = [0, 32], sizes = [1, 32], strides = [1, 1]} : vector<1x128xf32> to vector<1x32xf32>
    %500 = arith.negf %499 : vector<1x32xf32>
    %501 = math.exp %500 : vector<1x32xf32>
    %cst_104 = arith.constant 1.000000e+00 : f32
    %502 = vector.broadcast %cst_104 : f32 to vector<1x32xf32>
    %503 = arith.addf %502, %501 : vector<1x32xf32>
    %504 = arith.divf %502, %503 : vector<1x32xf32>
    %505 = vector.extract_strided_slice %492 {offsets = [0, 64], sizes = [1, 32], strides = [1, 1]} : vector<1x128xf32> to vector<1x32xf32>
    %506 = math.tanh %505 : vector<1x32xf32>
    %507 = vector.extract_strided_slice %492 {offsets = [0, 96], sizes = [1, 32], strides = [1, 1]} : vector<1x128xf32> to vector<1x32xf32>
    %508 = arith.negf %507 : vector<1x32xf32>
    %509 = math.exp %508 : vector<1x32xf32>
    %cst_105 = arith.constant 1.000000e+00 : f32
    %510 = vector.broadcast %cst_105 : f32 to vector<1x32xf32>
    %511 = arith.addf %510, %509 : vector<1x32xf32>
    %512 = arith.divf %510, %511 : vector<1x32xf32>
    %513 = arith.mulf %504, %486 : vector<1x32xf32>
    %514 = arith.mulf %498, %506 : vector<1x32xf32>
    %515 = arith.addf %513, %514 : vector<1x32xf32>
    %516 = math.tanh %515 : vector<1x32xf32>
    %517 = arith.mulf %512, %516 : vector<1x32xf32>
    %518 = tpu.concatenate %314, %343, %372, %401, %430, %459, %488, %517 in 0 : vector<1x32xf32>, vector<1x32xf32>, vector<1x32xf32>, vector<1x32xf32>, vector<1x32xf32>, vector<1x32xf32>, vector<1x32xf32>, vector<1x32xf32> -> vector<8x32xf32>
    %c0_106 = arith.constant 0 : index
    %c0_107 = arith.constant 0 : index
    %519 = vector.load %arg8[%c0_106, %c0_107] : memref<32x128xf32, #tpu.memory_space<vmem>>, vector<32x128xf32>
    %cst_108 = arith.constant dense<0.000000e+00> : vector<8x128xf32>
    %520 = tpu.matmul %518, %519, %cst_108 {dimension_numbers = #tpu.dot_dimension_numbers<[1], [0], [0], [1], [0, 0, 1, 1], [], []>} : vector<8x32xf32>, vector<32x128xf32>, vector<8x128xf32> -> vector<8x128xf32>
    %c0_109 = arith.constant 0 : index
    %c0_110 = arith.constant 0 : index
    %521 = vector.load %arg9[%c0_109, %c0_110] : memref<1x128xf32, #tpu.memory_space<vmem>>, vector<1x128xf32>
    %522 = vector.broadcast %521 : vector<1x128xf32> to vector<8x128xf32>
    %523 = arith.addf %520, %522 : vector<8x128xf32>
    %cst_111 = arith.constant 0.000000e+00 : f32
    %524 = vector.broadcast %cst_111 : f32 to vector<8x128xf32>
    %525 = arith.maximumf %523, %524 : vector<8x128xf32>
    %cst_112 = arith.constant dense<0xFF800000> : vector<8xf32>
    %526 = vector.multi_reduction <maximumf>, %525, %cst_112 [1] : vector<8x128xf32> to vector<8xf32>
    %527 = vector.shape_cast %526 : vector<8xf32> to vector<8x1xf32>
    %528 = vector.broadcast %527 : vector<8x1xf32> to vector<8x128xf32>
    %529 = arith.subf %525, %528 : vector<8x128xf32>
    %530 = math.exp %529 : vector<8x128xf32>
    %cst_113 = arith.constant dense<0.000000e+00> : vector<8xf32>
    %531 = vector.multi_reduction <add>, %530, %cst_113 [1] : vector<8x128xf32> to vector<8xf32>
    %532 = vector.shape_cast %531 : vector<8xf32> to vector<8x1xf32>
    %533 = math.log %532 : vector<8x1xf32>
    %534 = arith.addf %527, %533 : vector<8x1xf32>
    %535 = vector.broadcast %534 : vector<8x1xf32> to vector<8x128xf32>
    %536 = arith.subf %525, %535 : vector<8x128xf32>
    %c0_114 = arith.constant 0 : index
    %c0_115 = arith.constant 0 : index
    %537 = vector.load %arg10[%c0_114, %c0_115] : memref<8x128xf32, #tpu.memory_space<vmem>>, vector<8x128xf32>
    tpu.vector_store %arg10[%c0_114, %c0_115], %536 {strides = array<i32>} : memref<8x128xf32, #tpu.memory_space<vmem>>, vector<8x128xf32>,
    return
  }
  func.func @transform_0(%arg0: i32, %arg1: memref<8xi32, #tpu.memory_space<smem>>) -> (i32, i32) {
    %c0_i32 = arith.constant 0 : i32
    %c0_i32_0 = arith.constant 0 : i32
    %c0_i32_1 = arith.constant 0 : i32
    return %c0_i32, %c0_i32_0 : i32, i32
  }
  func.func @transform_1(%arg0: i32, %arg1: memref<8xi32, #tpu.memory_space<smem>>) -> (i32, i32) {
    %c0_i32 = arith.constant 0 : i32
    %c0_i32_0 = arith.constant 0 : i32
    %c0_i32_1 = arith.constant 0 : i32
    return %c0_i32, %c0_i32_0 : i32, i32
  }
  func.func @transform_2(%arg0: i32, %arg1: memref<8xi32, #tpu.memory_space<smem>>) -> (i32, i32) {
    %c0_i32 = arith.constant 0 : i32
    %c0_i32_0 = arith.constant 0 : i32
    %c0_i32_1 = arith.constant 0 : i32
    return %c0_i32, %c0_i32_0 : i32, i32
  }
  func.func @transform_3(%arg0: i32, %arg1: memref<8xi32, #tpu.memory_space<smem>>) -> (i32, i32) {
    %c0_i32 = arith.constant 0 : i32
    %c0_i32_0 = arith.constant 0 : i32
    %c0_i32_1 = arith.constant 0 : i32
    return %c0_i32, %c0_i32_0 : i32, i32
  }
  func.func @transform_4(%arg0: i32, %arg1: memref<8xi32, #tpu.memory_space<smem>>) -> (i32, i32) {
    %c0_i32 = arith.constant 0 : i32
    %c0_i32_0 = arith.constant 0 : i32
    %c0_i32_1 = arith.constant 0 : i32
    return %c0_i32, %c0_i32_0 : i32, i32
  }
  func.func @transform_5(%arg0: i32, %arg1: memref<8xi32, #tpu.memory_space<smem>>) -> (i32, i32) {
    %c0_i32 = arith.constant 0 : i32
    %c0_i32_0 = arith.constant 0 : i32
    %c0_i32_1 = arith.constant 0 : i32
    return %c0_i32, %c0_i32_0 : i32, i32
  }
  func.func @transform_6(%arg0: i32, %arg1: memref<8xi32, #tpu.memory_space<smem>>) -> (i32, i32) {
    %c0_i32 = arith.constant 0 : i32
    %c0_i32_0 = arith.constant 0 : i32
    %c0_i32_1 = arith.constant 0 : i32
    return %c0_i32, %c0_i32_0 : i32, i32
  }
  func.func @transform_7(%arg0: i32, %arg1: memref<8xi32, #tpu.memory_space<smem>>) -> (i32, i32) {
    %c0_i32 = arith.constant 0 : i32
    %c0_i32_0 = arith.constant 0 : i32
    %c0_i32_1 = arith.constant 0 : i32
    return %c0_i32, %c0_i32_0 : i32, i32
  }
  func.func @transform_8(%arg0: i32, %arg1: memref<8xi32, #tpu.memory_space<smem>>) -> (i32, i32) {
    %c0_i32 = arith.constant 0 : i32
    %c0_i32_0 = arith.constant 0 : i32
    %c0_i32_1 = arith.constant 0 : i32
    return %c0_i32, %c0_i32_0 : i32, i32
  }
}

</mosaic_0001>

<bundles_post_ra>
// kernel: rnn_model_forward.1
= control target key start
LH: loop header
LB: loop body
LE: loop exit
PB: predicated region body
PF: predicated region fallthrough
CT: control target
= control target key end

     0   :  { %s1833_s12 = smov [#allocation3]   ;;  %s2148_s0 = inlined_call_operand.hbm [shape: s32[8], index: 0, kind: input, shape index: {}]   ;;  %s2149_s1 = inlined_call_operand.hbm [shape: f32[128,128], index: 1, kind: input, shape index: {}]   ;;  %s2150_s2 = inlined_call_operand.hbm [shape: f32[32,128], index: 2, kind: input, shape index: {}]   ;;  %s2151_s3 = inlined_call_operand.hbm [shape: f32[1,128], index: 3, kind: input, shape index: {}]   ;;  %s2152_s4 = inlined_call_operand.hbm [shape: f32[32,128], index: 4, kind: input, shape index: {}]   ;;  %s2153_s5 = inlined_call_operand.hbm [shape: f32[32,128], index: 5, kind: input, shape index: {}]   ;;  %s2154_s6 = inlined_call_operand.vmem [shape: f32[1,128], index: 6, kind: input, shape index: {}]   ;;  %s2155_s7 = inlined_call_operand.hbm [shape: f32[32,128], index: 7, kind: input, shape index: {}]   ;;  %s2156_s8 = inlined_call_operand.vmem [shape: f32[1,128], index: 8, kind: input, shape index: {}]   ;;  %s2157_s9 = inlined_call_operand.hbm [shape: f32[8,128], index: 9, kind: output, shape index: {}]  }
   0x1   :  { %s15_s11 = sshll.u32 %s2148_s0, 4  ;;  %s16_s11 = int_to_ptr.hbm [resolvable:$true] %s15_s11 }
   0x2   :  { %18 = dma.hbm_to_smem %s16_s11, 16, %s1833_s12, [#allocation2] }
   0x3   :  { %1821 = dma.done.wait [#allocation2], 16 }
   0x4   :  { %1822 = vsyncadd [#allocation2], 4294967280 }
   0x5   :  { %21 = sfence }
   0x6   :  { %22 = vsyncpa [#allocation5], 0 }
   0x7   :  { %23 = vsyncpa [#allocation8], 0 }
   0x8   :  { %24 = vsyncpa [#allocation11], 0 }
   0x9   :  { %25 = vsyncpa [#allocation14], 0 }
   0xa   :  { %26 = vsyncpa [#allocation6], 0  ;;  %s44_s15 = sshll.u32 %s2150_s2, 4  ;;  %s1834_s16 = smov [#allocation7]   ;;  %s45_s15 = int_to_ptr.hbm [resolvable:$true] %s44_s15 }
   0xb   :  { %s46_s17 = sshll.u32 %s1834_s16, 4  ;;  %s68_s19 = sshll.u32 %s2152_s4, 4  ;;  %s47_s17 = int_to_ptr.vmem [resolvable:$true] %s46_s17  ;;  %s69_s19 = int_to_ptr.hbm [resolvable:$true] %s68_s19 }
   0xc   :  { %s1835_s20 = smov 128   ;;  %s1836_s21 = smov 8  }
   0xd   :  { %52 = dma.hbm_to_vmem [thread:$0]  %s45_s15, 512, %s47_s17, [#allocation8], %s1835_s20, %s1835_s20, %s1836_s21  }
   0xe   :  { %s1837_s22 = smov [#allocation10]   ;;  %s31_s2 = sshll.u32 %s2149_s1, 4  ;;  %s32_s2 = int_to_ptr.hbm [resolvable:$true] %s31_s2 }
   0xf   :  { %s70_s23 = sshll.u32 %s1837_s22, 4  ;;  %s58_s27 = sshll.u32 %s2151_s3, 4  ;;  %s71_s23 = int_to_ptr.vmem [resolvable:$true] %s70_s23  ;;  %s59_s27 = int_to_ptr.hbm [resolvable:$true] %s58_s27 }
  0x10   :  { %76 = dma.hbm_to_vmem [thread:$0]  %s69_s19, 512, %s71_s23, [#allocation11], %s1835_s20, %s1835_s20, %s1836_s21  }
  0x11   :  { %s1838_s28 = smov [#allocation4]   ;;  %s1839_s30 = smov [#allocation9]  }
  0x12   :  { %s33_s29 = sshll.u32 %s1838_s28, 4  ;;  %s60_s1 = sshll.u32 %s1839_s30, 4  ;;  %s34_s29 = int_to_ptr.vmem [resolvable:$true] %s33_s29  ;;  %s61_s1 = int_to_ptr.vmem [resolvable:$true] %s60_s1 }
  0x13   :  { %39 = dma.hbm_to_vmem [thread:$0]  %s32_s2, 2048, %s34_s29, [#allocation5], %s1835_s20, %s1835_s20, %s1836_s21  }
  0x14   :  { %s81_s12 = sshll.u32 %s2153_s5, 4  ;;  %s96_s3 = sshll.u32 %s2155_s7, 4  ;;  %s82_s12 = int_to_ptr.hbm [resolvable:$true] %s81_s12  ;;  %s97_s3 = int_to_ptr.hbm [resolvable:$true] %s96_s3 }
  0x15   :  { %63 = dma.hbm_to_vmem [thread:$0]  %s59_s27, 16, %s61_s1, [#allocation8]  }
  0x16   :  { %s1840_s15 = smov [#allocation12]   ;;  %s1841_s17 = smov [#allocation13]  }
  0x17   :  { %s83_s16 = sshll.u32 %s1840_s15, 4  ;;  %s98_s0 = sshll.u32 %s1841_s17, 4  ;;  %s84_s16 = int_to_ptr.vmem [resolvable:$true] %s83_s16  ;;  %s99_s0 = int_to_ptr.vmem [resolvable:$true] %s98_s0 }
  0x18   :  { %89 = dma.hbm_to_vmem [thread:$0]  %s82_s12, 512, %s84_s16, [#allocation11], %s1835_s20, %s1835_s20, %s1836_s21  }
  0x19   :  { %104 = dma.hbm_to_vmem [thread:$0]  %s97_s3, 512, %s99_s0, [#allocation14], %s1835_s20, %s1835_s20, %s1836_s21  }
  0x1a   :  { %1823 = dma.done.wait [#allocation5], 2048  }
  0x1b   :  { %1824 = vsyncadd [#allocation5], 4294965248 }
  0x1c   :  { %1825 = dma.done.wait [#allocation8], 528  }
  0x1d   :  { %1826 = vsyncadd [#allocation8], 4294966768 }
  0x1e   :  { %1827 = dma.done.wait [#allocation11], 1024  }
  0x1f   :  { %1828 = vsyncadd [#allocation11], 4294966272 }
  0x20   :  { %1829 = dma.done.wait [#allocation14], 512  }
  0x21   :  { %1830 = vsyncadd [#allocation14], 4294966784  ;;  %s133_s5 = sld [smem:[#allocation3]]  ;;  %v131_v0 = vlaneseq  ;;  %v202_v1 = vld [vmem:[#allocation4 + $0x78] sm:$0xff]  ;;  %v201_v2 = vld [vmem:[#allocation4 + $0x70] sm:$0xff]  ;;  %vm173_vm2 = vcmask 1040384  }
  0x22   :  { %s1447_s7 = sld [smem:[#allocation3 + $0x1]]  ;;  %207 = vmatpush.msra.mxu0 %v202_v1  ;;  %v200_v4 = vld [vmem:[#allocation4 + $0x68] sm:$0xff]  ;;  %v199_v7 = vld [vmem:[#allocation4 + $0x60] sm:$0xff]  ;;  %v1940_v8 = vld [vmem:[#allocation7 + $0x18] sm:$0xff]  ;;  %v1842_v14 = vmov 0.0   ;;  %vm175_vm4 = vcmask 1041408  }
  0x23   :  { %s1932_s18 = sld [smem:[#allocation3 + $0x2]]  ;;  %v1936_v3 = vand.u32 127, %v131_v0  ;;  %247 = vmatpush.msra.mxu1 %v1940_v8  ;;  %v1943_v9 = vld [vmem:[#allocation7 + $0x10] sm:$0xff]  ;;  %v198_v11 = vld [vmem:[#allocation4 + $0x58] sm:$0xff]  ;;  %v1948_v12 = vld [vmem:[#allocation7 + $0x8] sm:$0xff]  ;;  %310 = vmatpush.msra.mxu2 %v1940_v8  ;;  %vm177_vm6 = vcmask 1042432  }
  0x24   :  { %s1934_s19 = sld [smem:[#allocation3 + $0x3]]  ;;  %208 = vmatpush.msra.mxu0 %v201_v2  ;;  %380 = vmatpush.msra.mxu3 %v1940_v8  ;;  %v197_v13 = vld [vmem:[#allocation4 + $0x50] sm:$0xff]  ;;  %v1959_v18 = vld [vmem:[#allocation7] sm:$0xff]  ;;  %v196_v19 = vld [vmem:[#allocation4 + $0x48] sm:$0xff]  ;;  %vm179_vm8 = vcmask 1043456   ;;  %vm181_vm10 = vcmask 1044480  }
  0x25   :  { %s1938_s20 = sld [smem:[#allocation3 + $0x4]]  ;;  %248 = vmatpush.msra.mxu1 %v1943_v9  ;;  %311 = vmatpush.msra.mxu2 %v1943_v9  ;;  %v195_v23 = vld [vmem:[#allocation4 + $0x40] sm:$0xff]  ;;  %v194_v24 = vld [vmem:[#allocation4 + $0x38] sm:$0xff]  ;;  %v193_v28 = vld [vmem:[#allocation4 + $0x30] sm:$0xff]  ;;  %vm183_vm13 = vcmask 1045504   ;;  %vm185_vm14 = vcmask 1046528  }
  0x26   :  { %209 = vmatpush.msra.mxu0 %v200_v4  ;;  %s1950_s21 = sld [smem:[#allocation3 + $0x5]]  ;;  %381 = vmatpush.msra.mxu3 %v1943_v9  ;;  %v192_v32 = vld [vmem:[#allocation4 + $0x28] sm:$0xff]  ;;  %v191_v33 = vld [vmem:[#allocation4 + $0x20] sm:$0xff]  ;;  %v190_v37 = vld [vmem:[#allocation4 + $0x18] sm:$0xff]  ;;  %s1843_s24 = smov 64  }
  0x27   :  { %v134_v5 = vstv %s133_s5  ;;  %249 = vmatpush.msra.mxu1 %v1948_v12  ;;  %s1964_s22 = sld [smem:[#allocation3 + $0x6]]  ;;  %312 = vmatpush.msra.mxu2 %v1948_v12  ;;  %v189_v40 = vld [vmem:[#allocation4 + $0x10] sm:$0xff]  ;;  %v188_v41 = vld [vmem:[#allocation4 + $0x8] sm:$0xff]  ;;  %v187_v44 = vld [vmem:[#allocation4] sm:$0xff]  ;;  %s1844_s25 = smov 32  }
  0x28   :  { %v139_v6 = vstv %s1447_s7  ;;  %vm135_vm0 = vcmp.eq.s32.totalorder %v1936_v3, %v134_v5  ;;  %210 = vmatpush.msra.mxu0 %v199_v7  ;;  %382 = vmatpush.msra.mxu3 %v1948_v12  ;;  %s1973_s23 = sld [smem:[#allocation3 + $0x7]]  ;;  %v1506_v46 = vld [vmem:[#allocation9] ss:$0 sm:$0xff]  ;;  %s1845_s27 = smov [#allocation15]  }
  0x29   :  { %vm140_vm1 = vcmp.eq.s32.totalorder %v1936_v3, %v139_v6  ;;  %v144_v10 = vstv %s1932_s18  ;;  %v1446_v15 = vsel %vm135_vm0, 1.0, %v1842_v14  ;;  %250 = vmatpush.msra.mxu1 %v1959_v18  ;;  %313 = vmatpush.msra.mxu2 %v1959_v18  ;;  %s1431_s28 = sshll.u32 %s1845_s27, 4  ;;  %s1432_s28 = int_to_ptr.vmem [resolvable:$true] %s1431_s28 }
  0x2a   :  { %v1448_v16 = vsel %vm140_vm1, 1.0, %v1842_v14  ;;  %vm145_vm3 = vcmp.eq.s32.totalorder %v1936_v3, %v144_v10  ;;  %v149_v17 = vstv %s1934_s19  ;;  %211 = vmatpush.msra.mxu0 %v198_v11  ;;  %251 = vmatmul.f32.vlgmr.msra.gmra.mxu1 %v1842_v14 }
  0x2b   :  { %v1450_v20 = vsel %vm145_vm3, 1.0, %v1842_v14  ;;  %vm150_vm5 = vcmp.eq.s32.totalorder %v1936_v3, %v149_v17  ;;  %v154_v21 = vstv %s1938_s20  ;;  %v174_v22 = vsel %vm173_vm2, %v1446_v15, %v1448_v16  ;;  %383 = vmatpush.msra.mxu3 %v1959_v18  ;;  %450 = vmatpush.msrb.mxu1 %v1940_v8 }
  0x2c   :  { %212 = vmatpush.msra.mxu0 %v197_v13  ;;  %v1452_v25 = vsel %vm150_vm5, 1.0, %v1842_v14  ;;  %vm155_vm7 = vcmp.eq.s32.totalorder %v1936_v3, %v154_v21  ;;  %v159_v26 = vstv %s1950_s21  ;;  %v176_v27 = vsel %vm175_vm4, %v174_v22, %v1450_v20  ;;  %520 = vmatpush.msrb.mxu2 %v1940_v8 }
  0x2d   :  { %590 = vmatpush.msrb.mxu3 %v1940_v8  ;;  %451 = vmatpush.msrb.mxu1 %v1943_v9  ;;  %v1454_v29 = vsel %vm155_vm7, 1.0, %v1842_v14  ;;  %vm160_vm9 = vcmp.eq.s32.totalorder %v1936_v3, %v159_v26  ;;  %v164_v30 = vstv %s1964_s22  ;;  %v178_v31 = vsel %vm177_vm6, %v176_v27, %v1452_v25 }
  0x2e   :  { %213 = vmatpush.msra.mxu0 %v196_v19  ;;  %521 = vmatpush.msrb.mxu2 %v1943_v9  ;;  %v1456_v34 = vsel %vm160_vm9, 1.0, %v1842_v14  ;;  %vm165_vm11 = vcmp.eq.s32.totalorder %v1936_v3, %v164_v30  ;;  %v169_v35 = vstv %s1973_s23  ;;  %v180_v36 = vsel %vm179_vm8, %v178_v31, %v1454_v29 }
  0x2f   :  { %591 = vmatpush.msrb.mxu3 %v1943_v9  ;;  %452 = vmatpush.msrb.mxu1 %v1948_v12  ;;  %v1458_v38 = vsel %vm165_vm11, 1.0, %v1842_v14  ;;  %vm170_vm12 = vcmp.eq.s32.totalorder %v1936_v3, %v169_v35  ;;  %v182_v39 = vsel %vm181_vm10, %v180_v36, %v1456_v34  ;;  %vm231_vm5 = vcmask 261120  }
  0x30   :  { %214 = vmatpush.msra.mxu0 %v195_v23  ;;  %522 = vmatpush.msrb.mxu2 %v1948_v12  ;;  %v1460_v42 = vsel %vm170_vm12, 1.0, %v1842_v14  ;;  %v184_v43 = vsel %vm183_vm13, %v182_v39, %v1458_v38 }
  0x31   :  { %592 = vmatpush.msrb.mxu3 %v1948_v12  ;;  %453 = vmatpush.msrb.mxu1 %v1959_v18  ;;  %v186_v45 = vsel %vm185_vm14, %v184_v43, %v1460_v42 }
  0x32   :  { %215 = vmatpush.msra.mxu0 %v194_v24  ;;  %523 = vmatpush.msrb.mxu2 %v1959_v18 }
  0x33   :  { %593 = vmatpush.msrb.mxu3 %v1959_v18  ;;  %660 = vmatpush.msra.mxu1 %v1940_v8 }
  0x34   :  { %216 = vmatpush.msra.mxu0 %v193_v28 }
  0x35   :  { %661 = vmatpush.msra.mxu1 %v1943_v9 }
  0x36   :  { %217 = vmatpush.msra.mxu0 %v192_v32 }
  0x37   :  { %662 = vmatpush.msra.mxu1 %v1948_v12 }
  0x38   :  { %218 = vmatpush.msra.mxu0 %v191_v33 }
  0x39   :  { %663 = vmatpush.msra.mxu1 %v1959_v18 }
  0x3a   :  { %219 = vmatpush.msra.mxu0 %v190_v37 }
  0x3c   :  { %220 = vmatpush.msra.mxu0 %v189_v40 }
  0x3e   :  { %221 = vmatpush.msra.mxu0 %v188_v41 }
  0x40   :  { %222 = vmatpush.msra.mxu0 %v187_v44 }
  0x41   :  { %223 = vmatmul.f32.vlgmr.msra.gmra.mxu0 %v186_v45 }
  0xa7   :  { %v252_v48 = vpop.f32.mrf.mxu1 }
  0xbe   :  { %v224_v47 = vpop.f32.mrf.mxu0 }
  0xbf   :  { %v2012_v49 = vadd.f32 %v1506_v46, %v224_v47 }
  0xc1   :  { %v255_v50 = vadd.f32 %v252_v48, %v2012_v49 }
  0xc3   :  { %1509 = vtanh.f32 %v255_v50  ;;  %v1461_v52 = vmul.f32 -1.442695, %v255_v50 }
  0xc5   :  { %1511 = vpow2.f32 %v1461_v52 }
  0xc9   :  { %v1510_v51 = vpop.eup %1509 }
  0xca   :  { %278 = vrot.lane.b32.xlu0 %v1510_v51, %s1843_s24 }
  0xcb   :  { %v1512_v53 = vpop.eup %1511 }
  0xcc   :  { %v259_v54 = vadd.f32 1.0, %v1512_v53 }
  0xce   :  { %1513 = vrcp.f32 %v259_v54  ;;  %v271_v60 = vand.u32 2147483648, %v259_v54  ;;  %vm265_vm0 = vweird.f32 %v259_v54  ;;  %v269_v61 = vand.u32 2147483647, %v259_v54 }
  0xd0   :  { %v272_v63 = vor.u32 1.1754944e-38, %v271_v60  ;;  %vm270_vm3 = vcmp.eq.f32.partialorder %v269_v61, 8.507059e+37 }
  0xd4   :  { %v1514_v55 = vpop.eup %1513 }
  0xd5   :  { %v261_v56 = vmul.f32 %v1514_v55, %v259_v54  ;;  %vm266_vm15 = vweird.f32 %v1514_v55 }
  0xd6   :  { %vm267_vm1 = vmor %vm265_vm0, %vm266_vm15 }
  0xd7   :  { %v262_v57 = vsub.f32 1.0, %v261_v56 }
  0xd9   :  { %v263_v58 = vmul.f32 %v1514_v55, %v262_v57 }
  0xdb   :  { %v264_v59 = vadd.f32 %v1514_v55, %v263_v58 }
  0xdd   :  { %v268_v62 = vsel %vm267_vm1, %v1514_v55, %v264_v59 }
  0xde   :  { %v273_v1 = vsel %vm270_vm3, %v272_v63, %v268_v62 }
  0xdf   :  { %v276_v3 = vmul.f32 0.0, %v273_v1 }
 0x13c   :  { %v279_v0 = vpop.permute.xlu0 %278 }
 0x13d   :  { %v281_v2 = vmul.f32 %v279_v0, %v273_v1 }
 0x13f   :  { %283 = vrot.lane.b32.xlu0 %v281_v2, %s1844_s25 }
 0x1b1   :  { %v284_v4 = vpop.permute.xlu0 %283 }
 0x1b2   :  { %v286_v5 = vadd.f32 %v284_v4, %v276_v3 }
 0x1b4   :  { %1515 = vtanh.f32 %v286_v5  ;;  %v343_v30 = vrot.slane %v286_v5, 7 }
 0x1ba   :  { %v1516_v6 = vpop.eup %1515 }
 0x1bb   :  { %289 = vrot.lane.b32.xlu1 %v1516_v6, %s1843_s24 }
 0x22d   :  { %v290_v7 = vpop.permute.xlu1 %289 }
 0x22e   :  { %v2018_v10 = vmul.f32 %v290_v7, %v273_v1 }
 0x230   :  { %294 = vrot.lane.b32.xlu1 %v2018_v10, %s1844_s25 }
 0x2a2   :  { %v295_v11 = vpop.permute.xlu1 %294 }
 0x2a3   :  { %1462 = vmatmul.msk.f32.vlgmr.msra.gmra.mxu2 %vm231_vm5, %v295_v11 }
 0x2a4   :  { %730 = vmatpush.msra.mxu2 %v1940_v8 }
 0x2a6   :  { %731 = vmatpush.msra.mxu2 %v1943_v9 }
 0x2a8   :  { %732 = vmatpush.msra.mxu2 %v1948_v12 }
 0x2aa   :  { %733 = vmatpush.msra.mxu2 %v1959_v18 }
 0x326   :  { %v315_v13 = vpop.f32.mrf.mxu2 }
 0x327   :  { %v319_v15 = vrot.slane %v315_v13, 7 }
 0x329   :  { %v321_v16 = vadd.f32 %v319_v15, %v2012_v49 }
 0x32b   :  { %1517 = vtanh.f32 %v321_v16  ;;  %v1463_v19 = vmul.f32 -1.442695, %v321_v16 }
 0x32d   :  { %1519 = vpow2.f32 %v1463_v19 }
 0x331   :  { %v1518_v17 = vpop.eup %1517 }
 0x332   :  { %347 = vrot.lane.b32.xlu2 %v1518_v17, %s1843_s24 }
 0x333   :  { %v1520_v20 = vpop.eup %1519 }
 0x334   :  { %v325_v21 = vadd.f32 1.0, %v1520_v20 }
 0x336   :  { %1521 = vrcp.f32 %v325_v21  ;;  %v337_v18 = vand.u32 2147483648, %v325_v21  ;;  %vm331_vm9 = vweird.f32 %v325_v21  ;;  %v335_v24 = vand.u32 2147483647, %v325_v21 }
 0x338   :  { %v338_v26 = vor.u32 1.1754944e-38, %v337_v18  ;;  %vm336_vm12 = vcmp.eq.f32.partialorder %v335_v24, 8.507059e+37 }
 0x33c   :  { %v1522_v8 = vpop.eup %1521 }
 0x33d   :  { %v327_v22 = vmul.f32 %v1522_v8, %v325_v21  ;;  %vm332_vm7 = vweird.f32 %v1522_v8 }
 0x33e   :  { %vm333_vm11 = vmor %vm331_vm9, %vm332_vm7 }
 0x33f   :  { %v328_v9 = vsub.f32 1.0, %v327_v22 }
 0x341   :  { %v329_v23 = vmul.f32 %v1522_v8, %v328_v9 }
 0x343   :  { %v330_v12 = vadd.f32 %v1522_v8, %v329_v23 }
 0x345   :  { %v334_v25 = vsel %vm333_vm11, %v1522_v8, %v330_v12 }
 0x346   :  { %v339_v28 = vsel %vm336_vm12, %v338_v26, %v334_v25 }
 0x347   :  { %v345_v31 = vmul.f32 %v343_v30, %v339_v28 }
 0x38c   :  { %v348_v27 = vpop.permute.xlu2 %347 }
 0x38d   :  { %v350_v29 = vmul.f32 %v348_v27, %v339_v28 }
 0x38f   :  { %352 = vrot.lane.b32.xlu2 %v350_v29, %s1844_s25 }
 0x3e9   :  { %v353_v32 = vpop.permute.xlu2 %352 }
 0x3ea   :  { %v355_v33 = vadd.f32 %v353_v32, %v345_v31 }
 0x3ec   :  { %1523 = vtanh.f32 %v355_v33  ;;  %v413_v59 = vrot.slane %v355_v33, 7 }
 0x3f2   :  { %v1524_v34 = vpop.eup %1523 }
 0x3f3   :  { %358 = vrot.lane.b32.xlu0 %v1524_v34, %s1843_s24 }
 0x465   :  { %v359_v35 = vpop.permute.xlu0 %358 }
 0x466   :  { %v361_v36 = vmul.f32 %v359_v35, %v339_v28 }
 0x468   :  { %v363_v37 = vrot.slane %v361_v36, 1  ;;  %v782_v2 = vsel %vm173_vm2, %v2018_v10, %v361_v36 }
 0x46a   :  { %364 = vrot.lane.b32.xlu1 %v363_v37, %s1844_s25 }
 0x4dc   :  { %v365_v38 = vpop.permute.xlu1 %364 }
 0x4dd   :  { %1464 = vmatmul.msk.f32.vlgmr.msra.gmra.mxu3 %vm231_vm5, %v365_v38 }
 0x560   :  { %v385_v39 = vpop.f32.mrf.mxu3 }
 0x561   :  { %v389_v40 = vrot.slane %v385_v39, 6 }
 0x563   :  { %v391_v41 = vadd.f32 %v389_v40, %v2012_v49 }
 0x565   :  { %1525 = vtanh.f32 %v391_v41  ;;  %v1465_v43 = vmul.f32 -1.442695, %v391_v41 }
 0x567   :  { %1527 = vpow2.f32 %v1465_v43 }
 0x56b   :  { %v1526_v42 = vpop.eup %1525 }
 0x56c   :  { %417 = vrot.lane.b32.xlu2 %v1526_v42, %s1843_s24 }
 0x56d   :  { %v1528_v44 = vpop.eup %1527 }
 0x56e   :  { %v395_v45 = vadd.f32 1.0, %v1528_v44 }
 0x570   :  { %1529 = vrcp.f32 %v395_v45  ;;  %v407_v52 = vand.u32 2147483648, %v395_v45  ;;  %vm401_vm0 = vweird.f32 %v395_v45  ;;  %v405_v53 = vand.u32 2147483647, %v395_v45 }
 0x572   :  { %v408_v55 = vor.u32 1.1754944e-38, %v407_v52  ;;  %vm406_vm3 = vcmp.eq.f32.partialorder %v405_v53, 8.507059e+37 }
 0x576   :  { %v1530_v46 = vpop.eup %1529 }
 0x577   :  { %v397_v47 = vmul.f32 %v1530_v46, %v395_v45  ;;  %vm402_vm15 = vweird.f32 %v1530_v46 }
 0x578   :  { %vm403_vm1 = vmor %vm401_vm0, %vm402_vm15 }
 0x579   :  { %v398_v48 = vsub.f32 1.0, %v397_v47 }
 0x57b   :  { %v399_v50 = vmul.f32 %v1530_v46, %v398_v48 }
 0x57d   :  { %v400_v51 = vadd.f32 %v1530_v46, %v399_v50 }
 0x57f   :  { %v404_v54 = vsel %vm403_vm1, %v1530_v46, %v400_v51 }
 0x580   :  { %v409_v57 = vsel %vm406_vm3, %v408_v55, %v404_v54 }
 0x581   :  { %v415_v60 = vmul.f32 %v413_v59, %v409_v57 }
 0x5c6   :  { %v418_v56 = vpop.permute.xlu2 %417 }
 0x5c7   :  { %v420_v58 = vmul.f32 %v418_v56, %v409_v57 }
 0x5c9   :  { %422 = vrot.lane.b32.xlu0 %v420_v58, %s1844_s25 }
 0x63b   :  { %v423_v61 = vpop.permute.xlu0 %422 }
 0x63c   :  { %v425_v62 = vadd.f32 %v423_v61, %v415_v60 }
 0x63e   :  { %1531 = vtanh.f32 %v425_v62  ;;  %v483_v26 = vrot.slane %v425_v62, 7 }
 0x644   :  { %v1532_v63 = vpop.eup %1531 }
 0x645   :  { %428 = vrot.lane.b32.xlu1 %v1532_v63, %s1843_s24 }
 0x6b7   :  { %v429_v0 = vpop.permute.xlu1 %428 }
 0x6b8   :  { %v431_v1 = vmul.f32 %v429_v0, %v409_v57 }
 0x6ba   :  { %v433_v3 = vrot.slane %v431_v1, 2  ;;  %v783_v4 = vsel %vm175_vm4, %v782_v2, %v431_v1 }
 0x6bc   :  { %434 = vrot.lane.b32.xlu2 %v433_v3, %s1844_s25 }
 0x716   :  { %v435_v5 = vpop.permute.xlu2 %434 }
 0x717   :  { %1466 = vmatmul.msk.f32.vlgmr.msrb.gmra.mxu1 %vm231_vm5, %v435_v5 }
 0x794   :  { %v455_v6 = vpop.f32.mrf.mxu1 }
 0x795   :  { %v459_v7 = vrot.slane %v455_v6, 5 }
 0x797   :  { %v461_v11 = vadd.f32 %v459_v7, %v2012_v49 }
 0x799   :  { %1533 = vtanh.f32 %v461_v11  ;;  %v1467_v15 = vmul.f32 -1.442695, %v461_v11 }
 0x79b   :  { %1535 = vpow2.f32 %v1467_v15 }
 0x79f   :  { %v1534_v13 = vpop.eup %1533 }
 0x7a0   :  { %487 = vrot.lane.b32.xlu0 %v1534_v13, %s1843_s24 }
 0x7a1   :  { %v1536_v16 = vpop.eup %1535 }
 0x7a2   :  { %v465_v10 = vadd.f32 1.0, %v1536_v16 }
 0x7a4   :  { %1537 = vrcp.f32 %v465_v10  ;;  %v477_v22 = vand.u32 2147483648, %v465_v10  ;;  %vm471_vm9 = vweird.f32 %v465_v10  ;;  %v475_v9 = vand.u32 2147483647, %v465_v10 }
 0x7a6   :  { %v478_v12 = vor.u32 1.1754944e-38, %v477_v22  ;;  %vm476_vm12 = vcmp.eq.f32.partialorder %v475_v9, 8.507059e+37 }
 0x7aa   :  { %v1538_v17 = vpop.eup %1537 }
 0x7ab   :  { %v467_v19 = vmul.f32 %v1538_v17, %v465_v10  ;;  %vm472_vm7 = vweird.f32 %v1538_v17 }
 0x7ac   :  { %vm473_vm11 = vmor %vm471_vm9, %vm472_vm7 }
 0x7ad   :  { %v468_v20 = vsub.f32 1.0, %v467_v19 }
 0x7af   :  { %v469_v21 = vmul.f32 %v1538_v17, %v468_v20 }
 0x7b1   :  { %v470_v8 = vadd.f32 %v1538_v17, %v469_v21 }
 0x7b3   :  { %v474_v23 = vsel %vm473_vm11, %v1538_v17, %v470_v8 }
 0x7b4   :  { %v479_v24 = vsel %vm476_vm12, %v478_v12, %v474_v23 }
 0x7b5   :  { %v485_v27 = vmul.f32 %v483_v26, %v479_v24 }
 0x812   :  { %v488_v18 = vpop.permute.xlu0 %487 }
 0x813   :  { %v490_v25 = vmul.f32 %v488_v18, %v479_v24 }
 0x815   :  { %492 = vrot.lane.b32.xlu1 %v490_v25, %s1844_s25 }
 0x887   :  { %v493_v28 = vpop.permute.xlu1 %492 }
 0x888   :  { %v495_v29 = vadd.f32 %v493_v28, %v485_v27 }
 0x88a   :  { %1539 = vtanh.f32 %v495_v29  ;;  %v553_v56 = vrot.slane %v495_v29, 7 }
 0x890   :  { %v1540_v30 = vpop.eup %1539 }
 0x891   :  { %498 = vrot.lane.b32.xlu2 %v1540_v30, %s1843_s24 }
 0x8eb   :  { %v499_v31 = vpop.permute.xlu2 %498 }
 0x8ec   :  { %v501_v32 = vmul.f32 %v499_v31, %v479_v24 }
 0x8ee   :  { %v503_v33 = vrot.slane %v501_v32, 3  ;;  %v784_v34 = vsel %vm177_vm6, %v783_v4, %v501_v32 }
 0x8f0   :  { %504 = vrot.lane.b32.xlu0 %v503_v33, %s1844_s25 }
 0x962   :  { %v505_v35 = vpop.permute.xlu0 %504 }
 0x963   :  { %1468 = vmatmul.msk.f32.vlgmr.msrb.gmra.mxu2 %vm231_vm5, %v505_v35 }
 0x9e6   :  { %v525_v36 = vpop.f32.mrf.mxu2 }
 0x9e7   :  { %v529_v37 = vrot.slane %v525_v36, 4 }
 0x9e9   :  { %v531_v38 = vadd.f32 %v529_v37, %v2012_v49 }
 0x9eb   :  { %1541 = vtanh.f32 %v531_v38  ;;  %v1469_v40 = vmul.f32 -1.442695, %v531_v38 }
 0x9ed   :  { %1543 = vpow2.f32 %v1469_v40 }
 0x9f1   :  { %v1542_v39 = vpop.eup %1541 }
 0x9f2   :  { %557 = vrot.lane.b32.xlu1 %v1542_v39, %s1843_s24 }
 0x9f3   :  { %v1544_v41 = vpop.eup %1543 }
 0x9f4   :  { %v535_v42 = vadd.f32 1.0, %v1544_v41 }
 0x9f6   :  { %1545 = vrcp.f32 %v535_v42  ;;  %v547_v48 = vand.u32 2147483648, %v535_v42  ;;  %vm541_vm0 = vweird.f32 %v535_v42  ;;  %v545_v50 = vand.u32 2147483647, %v535_v42 }
 0x9f8   :  { %v548_v52 = vor.u32 1.1754944e-38, %v547_v48  ;;  %vm546_vm3 = vcmp.eq.f32.partialorder %v545_v50, 8.507059e+37 }
 0x9fc   :  { %v1546_v43 = vpop.eup %1545 }
 0x9fd   :  { %v537_v44 = vmul.f32 %v1546_v43, %v535_v42  ;;  %vm542_vm15 = vweird.f32 %v1546_v43 }
 0x9fe   :  { %vm543_vm1 = vmor %vm541_vm0, %vm542_vm15 }
 0x9ff   :  { %v538_v45 = vsub.f32 1.0, %v537_v44 }
 0xa01   :  { %v539_v46 = vmul.f32 %v1546_v43, %v538_v45 }
 0xa03   :  { %v540_v47 = vadd.f32 %v1546_v43, %v539_v46 }
 0xa05   :  { %v544_v51 = vsel %vm543_vm1, %v1546_v43, %v540_v47 }
 0xa06   :  { %v549_v54 = vsel %vm546_vm3, %v548_v52, %v544_v51 }
 0xa07   :  { %v555_v57 = vmul.f32 %v553_v56, %v549_v54 }
 0xa64   :  { %v558_v53 = vpop.permute.xlu1 %557 }
 0xa65   :  { %v560_v55 = vmul.f32 %v558_v53, %v549_v54 }
 0xa67   :  { %562 = vrot.lane.b32.xlu2 %v560_v55, %s1844_s25 }
 0xac1   :  { %v563_v58 = vpop.permute.xlu2 %562 }
 0xac2   :  { %v565_v59 = vadd.f32 %v563_v58, %v555_v57 }
 0xac4   :  { %1547 = vtanh.f32 %v565_v59  ;;  %v623_v12 = vrot.slane %v565_v59, 7 }
 0xaca   :  { %v1548_v60 = vpop.eup %1547 }
 0xacb   :  { %568 = vrot.lane.b32.xlu0 %v1548_v60, %s1843_s24 }
 0xb3d   :  { %v569_v61 = vpop.permute.xlu0 %568 }
 0xb3e   :  { %v571_v62 = vmul.f32 %v569_v61, %v549_v54 }
 0xb40   :  { %v573_v63 = vrot.slane %v571_v62, 4  ;;  %v785_v0 = vsel %vm179_vm8, %v784_v34, %v571_v62 }
 0xb42   :  { %574 = vrot.lane.b32.xlu1 %v573_v63, %s1844_s25 }
 0xbb4   :  { %v575_v1 = vpop.permute.xlu1 %574 }
 0xbb5   :  { %1470 = vmatmul.msk.f32.vlgmr.msrb.gmra.mxu3 %vm231_vm5, %v575_v1 }
 0xc38   :  { %v595_v2 = vpop.f32.mrf.mxu3 }
 0xc39   :  { %v599_v3 = vrot.slane %v595_v2, 3 }
 0xc3b   :  { %v601_v4 = vadd.f32 %v599_v3, %v2012_v49 }
 0xc3d   :  { %1549 = vtanh.f32 %v601_v4  ;;  %v1471_v6 = vmul.f32 -1.442695, %v601_v4 }
 0xc3f   :  { %1551 = vpow2.f32 %v1471_v6 }
 0xc43   :  { %v1550_v5 = vpop.eup %1549 }
 0xc44   :  { %627 = vrot.lane.b32.xlu2 %v1550_v5, %s1843_s24 }
 0xc45   :  { %v1552_v7 = vpop.eup %1551 }
 0xc46   :  { %v605_v11 = vadd.f32 1.0, %v1552_v7 }
 0xc48   :  { %1553 = vrcp.f32 %v605_v11  ;;  %v617_v19 = vand.u32 2147483648, %v605_v11  ;;  %vm611_vm9 = vweird.f32 %v605_v11  ;;  %v615_v20 = vand.u32 2147483647, %v605_v11 }
 0xc4a   :  { %v618_v8 = vor.u32 1.1754944e-38, %v617_v19  ;;  %vm616_vm12 = vcmp.eq.f32.partialorder %v615_v20, 8.507059e+37 }
 0xc4e   :  { %v1554_v13 = vpop.eup %1553 }
 0xc4f   :  { %v607_v15 = vmul.f32 %v1554_v13, %v605_v11  ;;  %vm612_vm7 = vweird.f32 %v1554_v13 }
 0xc50   :  { %vm613_vm11 = vmor %vm611_vm9, %vm612_vm7 }
 0xc51   :  { %v608_v16 = vsub.f32 1.0, %v607_v15 }
 0xc53   :  { %v609_v10 = vmul.f32 %v1554_v13, %v608_v16 }
 0xc55   :  { %v610_v17 = vadd.f32 %v1554_v13, %v609_v10 }
 0xc57   :  { %v614_v21 = vsel %vm613_vm11, %v1554_v13, %v610_v17 }
 0xc58   :  { %v619_v9 = vsel %vm616_vm12, %v618_v8, %v614_v21 }
 0xc59   :  { %v625_v18 = vmul.f32 %v623_v12, %v619_v9  ;;  %v792_v12 = vld [vmem:[#allocation10 + $0x18] sm:$0xff] }
 0xc5a   :  { %814 = vmatpush.msra.mxu3 %v792_v12 }
 0xc9e   :  { %v628_v22 = vpop.permute.xlu2 %627 }
 0xc9f   :  { %v630_v23 = vmul.f32 %v628_v22, %v619_v9 }
 0xca1   :  { %632 = vrot.lane.b32.xlu0 %v630_v23, %s1844_s25 }
 0xd13   :  { %v633_v24 = vpop.permute.xlu0 %632 }
 0xd14   :  { %v635_v25 = vadd.f32 %v633_v24, %v625_v18  ;;  %v791_v18 = vld [vmem:[#allocation10 + $0x10] sm:$0xff]  ;;  %v790_v24 = vld [vmem:[#allocation10 + $0x8] sm:$0xff] }
 0xd15   :  { %815 = vmatpush.msra.mxu3 %v791_v18 }
 0xd16   :  { %1555 = vtanh.f32 %v635_v25  ;;  %v693_v52 = vrot.slane %v635_v25, 7  ;;  %v789_v25 = vld [vmem:[#allocation10] sm:$0xff] }
 0xd17   :  { %816 = vmatpush.msra.mxu3 %v790_v24 }
 0xd19   :  { %817 = vmatpush.msra.mxu3 %v789_v25 }
 0xd1c   :  { %v1556_v26 = vpop.eup %1555 }
 0xd1d   :  { %638 = vrot.lane.b32.xlu1 %v1556_v26, %s1843_s24 }
 0xd8f   :  { %v639_v27 = vpop.permute.xlu1 %638 }
 0xd90   :  { %v641_v28 = vmul.f32 %v639_v27, %v619_v9 }
 0xd92   :  { %v643_v29 = vrot.slane %v641_v28, 5  ;;  %v786_v30 = vsel %vm181_vm10, %v785_v0, %v641_v28 }
 0xd94   :  { %644 = vrot.lane.b32.xlu2 %v643_v29, %s1844_s25  ;;  %v825_v29 = vld [vmem:[#allocation12 + $0x18] sm:$0xff] }
 0xd95   :  { %838 = vmatpush.msrb.mxu1 %v825_v29  ;;  %901 = vmatpush.msrb.mxu2 %v825_v29 }
 0xd96   :  { %971 = vmatpush.msrb.mxu3 %v825_v29  ;;  %1041 = vmatpush.msrb.mxu0 %v825_v29 }
 0xdee   :  { %v645_v31 = vpop.permute.xlu2 %644 }
 0xdef   :  { %1472 = vmatmul.msk.f32.vlgmr.msra.gmra.mxu1 %vm231_vm5, %v645_v31  ;;  %v823_v31 = vld [vmem:[#allocation12 + $0x8] sm:$0xff] }
 0xe6c   :  { %v665_v32 = vpop.f32.mrf.mxu1 }
 0xe6d   :  { %v669_v33 = vrot.slane %v665_v32, 2  ;;  %v822_v32 = vld [vmem:[#allocation12] sm:$0xff] }
 0xe6f   :  { %v671_v34 = vadd.f32 %v669_v33, %v2012_v49 }
 0xe71   :  { %1557 = vtanh.f32 %v671_v34  ;;  %v1473_v36 = vmul.f32 -1.442695, %v671_v34 }
 0xe73   :  { %1559 = vpow2.f32 %v1473_v36 }
 0xe77   :  { %v1558_v35 = vpop.eup %1557 }
 0xe78   :  { %697 = vrot.lane.b32.xlu0 %v1558_v35, %s1843_s24 }
 0xe79   :  { %v1560_v37 = vpop.eup %1559 }
 0xe7a   :  { %v675_v38 = vadd.f32 1.0, %v1560_v37 }
 0xe7c   :  { %1561 = vrcp.f32 %v675_v38  ;;  %v687_v44 = vand.u32 2147483648, %v675_v38  ;;  %vm681_vm0 = vweird.f32 %v675_v38  ;;  %v685_v45 = vand.u32 2147483647, %v675_v38 }
 0xe7e   :  { %v688_v47 = vor.u32 1.1754944e-38, %v687_v44  ;;  %vm686_vm3 = vcmp.eq.f32.partialorder %v685_v45, 8.507059e+37 }
 0xe82   :  { %v1562_v39 = vpop.eup %1561 }
 0xe83   :  { %v677_v40 = vmul.f32 %v1562_v39, %v675_v38  ;;  %vm682_vm15 = vweird.f32 %v1562_v39 }
 0xe84   :  { %vm683_vm1 = vmor %vm681_vm0, %vm682_vm15 }
 0xe85   :  { %v678_v41 = vsub.f32 1.0, %v677_v40 }
 0xe87   :  { %v679_v42 = vmul.f32 %v1562_v39, %v678_v41 }
 0xe89   :  { %v680_v43 = vadd.f32 %v1562_v39, %v679_v42 }
 0xe8b   :  { %v684_v46 = vsel %vm683_vm1, %v1562_v39, %v680_v43 }
 0xe8c   :  { %v689_v50 = vsel %vm686_vm3, %v688_v47, %v684_v46 }
 0xe8d   :  { %v695_v53 = vmul.f32 %v693_v52, %v689_v50 }
 0xeea   :  { %v698_v48 = vpop.permute.xlu0 %697 }
 0xeeb   :  { %v700_v51 = vmul.f32 %v698_v48, %v689_v50 }
 0xeed   :  { %702 = vrot.lane.b32.xlu1 %v700_v51, %s1844_s25 }
 0xf5f   :  { %v703_v54 = vpop.permute.xlu1 %702 }
 0xf60   :  { %v705_v55 = vadd.f32 %v703_v54, %v695_v53 }
 0xf62   :  { %1563 = vtanh.f32 %v705_v55  ;;  %v763_v21 = vrot.slane %v705_v55, 7 }
 0xf68   :  { %v1564_v56 = vpop.eup %1563 }
 0xf69   :  { %708 = vrot.lane.b32.xlu2 %v1564_v56, %s1843_s24 }
 0xfc3   :  { %v709_v57 = vpop.permute.xlu2 %708 }
 0xfc4   :  { %v711_v58 = vmul.f32 %v709_v57, %v689_v50 }
 0xfc6   :  { %v713_v59 = vrot.slane %v711_v58, 6  ;;  %v787_v60 = vsel %vm183_vm13, %v786_v30, %v711_v58  ;;  %v824_v30 = vld [vmem:[#allocation12 + $0x10] sm:$0xff] }
 0xfc7   :  { %839 = vmatpush.msrb.mxu1 %v824_v30  ;;  %902 = vmatpush.msrb.mxu2 %v824_v30 }
 0xfc8   :  { %714 = vrot.lane.b32.xlu0 %v713_v59, %s1844_s25  ;;  %972 = vmatpush.msrb.mxu3 %v824_v30 }
 0xfc9   :  { %1042 = vmatpush.msrb.mxu0 %v824_v30  ;;  %840 = vmatpush.msrb.mxu1 %v823_v31 }
 0xfca   :  { %903 = vmatpush.msrb.mxu2 %v823_v31  ;;  %973 = vmatpush.msrb.mxu3 %v823_v31 }
 0xfcb   :  { %1043 = vmatpush.msrb.mxu0 %v823_v31  ;;  %841 = vmatpush.msrb.mxu1 %v822_v32 }
 0xfcc   :  { %904 = vmatpush.msrb.mxu2 %v822_v32  ;;  %842 = vmatmul.f32.vlgmr.msrb.gmra.mxu1 %v1842_v14  ;;  %v1507_v14 = vld [vmem:[%s2154_s6] ss:$0 sm:$0xff] }
 0xfcd   :  { %974 = vmatpush.msrb.mxu3 %v822_v32  ;;  %1044 = vmatpush.msrb.mxu0 %v822_v32 }
 0xfce   :  { %1111 = vmatpush.msra.mxu1 %v825_v29 }
 0xfcf   :  { %1321 = vmatpush.msra.mxu0 %v825_v29 }
 0xfd0   :  { %1112 = vmatpush.msra.mxu1 %v824_v30 }
 0xfd1   :  { %1322 = vmatpush.msra.mxu0 %v824_v30 }
 0xfd2   :  { %1113 = vmatpush.msra.mxu1 %v823_v31 }
 0xfd3   :  { %1323 = vmatpush.msra.mxu0 %v823_v31 }
 0xfd4   :  { %1114 = vmatpush.msra.mxu1 %v822_v32 }
 0xfd5   :  { %1324 = vmatpush.msra.mxu0 %v822_v32 }
0x103a   :  { %v715_v61 = vpop.permute.xlu0 %714 }
0x103b   :  { %1474 = vmatmul.msk.f32.vlgmr.msra.gmra.mxu2 %vm231_vm5, %v715_v61 }
0x103c   :  { %1181 = vmatpush.msra.mxu2 %v825_v29 }
0x103e   :  { %1182 = vmatpush.msra.mxu2 %v824_v30 }
0x1040   :  { %1183 = vmatpush.msra.mxu2 %v823_v31 }
0x1042   :  { %1184 = vmatpush.msra.mxu2 %v822_v32 }
0x1049   :  { %v843_v35 = vpop.f32.mrf.mxu1 }
0x10be   :  { %v735_v62 = vpop.f32.mrf.mxu2 }
0x10bf   :  { %v739_v63 = vrot.slane %v735_v62, 1 }
0x10c1   :  { %v741_v0 = vadd.f32 %v739_v63, %v2012_v49 }
0x10c3   :  { %1565 = vtanh.f32 %v741_v0  ;;  %v1475_v2 = vmul.f32 -1.442695, %v741_v0 }
0x10c5   :  { %1567 = vpow2.f32 %v1475_v2 }
0x10c9   :  { %v1566_v1 = vpop.eup %1565 }
0x10ca   :  { %767 = vrot.lane.b32.xlu1 %v1566_v1, %s1843_s24 }
0x10cb   :  { %v1568_v3 = vpop.eup %1567 }
0x10cc   :  { %v745_v4 = vadd.f32 1.0, %v1568_v3 }
0x10ce   :  { %1569 = vrcp.f32 %v745_v4  ;;  %v757_v15 = vand.u32 2147483648, %v745_v4  ;;  %vm751_vm9 = vweird.f32 %v745_v4  ;;  %v755_v16 = vand.u32 2147483647, %v745_v4 }
0x10d0   :  { %v758_v10 = vor.u32 1.1754944e-38, %v757_v15  ;;  %vm756_vm12 = vcmp.eq.f32.partialorder %v755_v16, 8.507059e+37 }
0x10d4   :  { %v1570_v5 = vpop.eup %1569 }
0x10d5   :  { %v747_v6 = vmul.f32 %v1570_v5, %v745_v4  ;;  %vm752_vm7 = vweird.f32 %v1570_v5 }
0x10d6   :  { %vm753_vm11 = vmor %vm751_vm9, %vm752_vm7 }
0x10d7   :  { %v748_v7 = vsub.f32 1.0, %v747_v6 }
0x10d9   :  { %v749_v11 = vmul.f32 %v1570_v5, %v748_v7 }
0x10db   :  { %v750_v13 = vadd.f32 %v1570_v5, %v749_v11 }
0x10dd   :  { %v754_v49 = vsel %vm753_vm11, %v1570_v5, %v750_v13 }
0x10de   :  { %v759_v19 = vsel %vm756_vm12, %v758_v10, %v754_v49 }
0x10df   :  { %v765_v8 = vmul.f32 %v763_v21, %v759_v19 }
0x113c   :  { %v768_v17 = vpop.permute.xlu1 %767 }
0x113d   :  { %v770_v20 = vmul.f32 %v768_v17, %v759_v19 }
0x113f   :  { %772 = vrot.lane.b32.xlu2 %v770_v20, %s1844_s25 }
0x1199   :  { %v773_v22 = vpop.permute.xlu2 %772 }
0x119a   :  { %v775_v9 = vadd.f32 %v773_v22, %v765_v8 }
0x119c   :  { %1571 = vtanh.f32 %v775_v9 }
0x11a2   :  { %v1572_v23 = vpop.eup %1571 }
0x11a3   :  { %778 = vrot.lane.b32.xlu0 %v1572_v23, %s1843_s24 }
0x1215   :  { %v779_v26 = vpop.permute.xlu0 %778 }
0x1216   :  { %v781_v27 = vmul.f32 %v779_v26, %v759_v19 }
0x1218   :  { %v788_v28 = vsel %vm185_vm14, %v787_v60, %v781_v27 }
0x1219   :  { %798 = vrot.lane.b32.xlu1 %v788_v28, %s1844_s25 }
0x128b   :  { %v799_v33 = vpop.permute.xlu1 %798 }
0x128c   :  { %1476 = vmatmul.msk.f32.vlgmr.msra.gmra.mxu3 %vm231_vm5, %v799_v33 }
0x128d   :  { %1251 = vmatpush.msra.mxu3 %v825_v29 }
0x128f   :  { %1252 = vmatpush.msra.mxu3 %v824_v30 }
0x1291   :  { %1253 = vmatpush.msra.mxu3 %v823_v31 }
0x1293   :  { %1254 = vmatpush.msra.mxu3 %v822_v32 }
0x130f   :  { %v819_v34 = vpop.f32.mrf.mxu3 }
0x1310   :  { %v2081_v36 = vadd.f32 %v1507_v14, %v819_v34 }
0x1312   :  { %v846_v37 = vadd.f32 %v843_v35, %v2081_v36 }
0x1314   :  { %1573 = vtanh.f32 %v846_v37  ;;  %v1477_v39 = vmul.f32 -1.442695, %v846_v37 }
0x1316   :  { %1575 = vpow2.f32 %v1477_v39 }
0x131a   :  { %v1574_v38 = vpop.eup %1573 }
0x131b   :  { %869 = vrot.lane.b32.xlu2 %v1574_v38, %s1843_s24 }
0x131c   :  { %v1576_v40 = vpop.eup %1575 }
0x131d   :  { %v850_v41 = vadd.f32 1.0, %v1576_v40 }
0x131f   :  { %1577 = vrcp.f32 %v850_v41  ;;  %v862_v47 = vand.u32 2147483648, %v850_v41  ;;  %vm856_vm0 = vweird.f32 %v850_v41  ;;  %v860_v48 = vand.u32 2147483647, %v850_v41 }
0x1321   :  { %v863_v51 = vor.u32 1.1754944e-38, %v862_v47  ;;  %vm861_vm3 = vcmp.eq.f32.partialorder %v860_v48, 8.507059e+37 }
0x1325   :  { %v1578_v42 = vpop.eup %1577 }
0x1326   :  { %v852_v43 = vmul.f32 %v1578_v42, %v850_v41  ;;  %vm857_vm15 = vweird.f32 %v1578_v42 }
0x1327   :  { %vm858_vm1 = vmor %vm856_vm0, %vm857_vm15 }
0x1328   :  { %v853_v44 = vsub.f32 1.0, %v852_v43 }
0x132a   :  { %v854_v45 = vmul.f32 %v1578_v42, %v853_v44 }
0x132c   :  { %v855_v46 = vadd.f32 %v1578_v42, %v854_v45 }
0x132e   :  { %v859_v50 = vsel %vm858_vm1, %v1578_v42, %v855_v46 }
0x132f   :  { %v864_v53 = vsel %vm861_vm3, %v863_v51, %v859_v50 }
0x1330   :  { %v867_v55 = vmul.f32 0.0, %v864_v53 }
0x1375   :  { %v870_v52 = vpop.permute.xlu2 %869 }
0x1376   :  { %v872_v54 = vmul.f32 %v870_v52, %v864_v53 }
0x1378   :  { %874 = vrot.lane.b32.xlu0 %v872_v54, %s1844_s25 }
0x13ea   :  { %v875_v56 = vpop.permute.xlu0 %874 }
0x13eb   :  { %v877_v57 = vadd.f32 %v875_v56, %v867_v55 }
0x13ed   :  { %1579 = vtanh.f32 %v877_v57  ;;  %v934_v21 = vrot.slane %v877_v57, 7 }
0x13f3   :  { %v1580_v58 = vpop.eup %1579 }
0x13f4   :  { %880 = vrot.lane.b32.xlu1 %v1580_v58, %s1843_s24 }
0x1466   :  { %v881_v59 = vpop.permute.xlu1 %880 }
0x1467   :  { %v2087_v60 = vmul.f32 %v881_v59, %v864_v53 }
0x1469   :  { %885 = vrot.lane.b32.xlu2 %v2087_v60, %s1844_s25 }
0x14c3   :  { %v886_v61 = vpop.permute.xlu2 %885 }
0x14c4   :  { %1478 = vmatmul.msk.f32.vlgmr.msrb.gmra.mxu2 %vm231_vm5, %v886_v61 }
0x1547   :  { %v906_v62 = vpop.f32.mrf.mxu2 }
0x1548   :  { %v910_v63 = vrot.slane %v906_v62, 7 }
0x154a   :  { %v912_v0 = vadd.f32 %v910_v63, %v2081_v36 }
0x154c   :  { %1581 = vtanh.f32 %v912_v0  ;;  %v1479_v2 = vmul.f32 -1.442695, %v912_v0 }
0x154e   :  { %1583 = vpow2.f32 %v1479_v2 }
0x1552   :  { %v1582_v1 = vpop.eup %1581 }
0x1553   :  { %938 = vrot.lane.b32.xlu0 %v1582_v1, %s1843_s24 }
0x1554   :  { %v1584_v3 = vpop.eup %1583 }
0x1555   :  { %v916_v4 = vadd.f32 1.0, %v1584_v3 }
0x1557   :  { %1585 = vrcp.f32 %v916_v4  ;;  %v928_v15 = vand.u32 2147483648, %v916_v4  ;;  %vm922_vm9 = vweird.f32 %v916_v4  ;;  %v926_v16 = vand.u32 2147483647, %v916_v4 }
0x1559   :  { %v929_v10 = vor.u32 1.1754944e-38, %v928_v15  ;;  %vm927_vm12 = vcmp.eq.f32.partialorder %v926_v16, 8.507059e+37 }
0x155d   :  { %v1586_v5 = vpop.eup %1585 }
0x155e   :  { %v918_v6 = vmul.f32 %v1586_v5, %v916_v4  ;;  %vm923_vm7 = vweird.f32 %v1586_v5 }
0x155f   :  { %vm924_vm11 = vmor %vm922_vm9, %vm923_vm7 }
0x1560   :  { %v919_v7 = vsub.f32 1.0, %v918_v6 }
0x1562   :  { %v920_v11 = vmul.f32 %v1586_v5, %v919_v7 }
0x1564   :  { %v921_v13 = vadd.f32 %v1586_v5, %v920_v11 }
0x1566   :  { %v925_v49 = vsel %vm924_vm11, %v1586_v5, %v921_v13 }
0x1567   :  { %v930_v19 = vsel %vm927_vm12, %v929_v10, %v925_v49 }
0x1568   :  { %v936_v8 = vmul.f32 %v934_v21, %v930_v19 }
0x15c5   :  { %v939_v17 = vpop.permute.xlu0 %938 }
0x15c6   :  { %v941_v20 = vmul.f32 %v939_v17, %v930_v19 }
0x15c8   :  { %943 = vrot.lane.b32.xlu1 %v941_v20, %s1844_s25 }
0x163a   :  { %v944_v22 = vpop.permute.xlu1 %943 }
0x163b   :  { %v946_v9 = vadd.f32 %v944_v22, %v936_v8 }
0x163d   :  { %1587 = vtanh.f32 %v946_v9  ;;  %v1004_v45 = vrot.slane %v946_v9, 7 }
0x1643   :  { %v1588_v23 = vpop.eup %1587 }
0x1644   :  { %949 = vrot.lane.b32.xlu2 %v1588_v23, %s1843_s24 }
0x169e   :  { %v950_v12 = vpop.permute.xlu2 %949 }
0x169f   :  { %v952_v18 = vmul.f32 %v950_v12, %v930_v19 }
0x16a1   :  { %v954_v24 = vrot.slane %v952_v18, 1  ;;  %v1373_v53 = vsel %vm173_vm2, %v2087_v60, %v952_v18 }
0x16a3   :  { %955 = vrot.lane.b32.xlu0 %v954_v24, %s1844_s25 }
0x1715   :  { %v956_v25 = vpop.permute.xlu0 %955 }
0x1716   :  { %1480 = vmatmul.msk.f32.vlgmr.msrb.gmra.mxu3 %vm231_vm5, %v956_v25 }
0x1799   :  { %v976_v26 = vpop.f32.mrf.mxu3 }
0x179a   :  { %v980_v27 = vrot.slane %v976_v26, 6 }
0x179c   :  { %v982_v28 = vadd.f32 %v980_v27, %v2081_v36 }
0x179e   :  { %1589 = vtanh.f32 %v982_v28  ;;  %v1481_v30 = vmul.f32 -1.442695, %v982_v28 }
0x17a0   :  { %1591 = vpow2.f32 %v1481_v30 }
0x17a4   :  { %v1590_v29 = vpop.eup %1589 }
0x17a5   :  { %1008 = vrot.lane.b32.xlu1 %v1590_v29, %s1843_s24 }
0x17a6   :  { %v1592_v31 = vpop.eup %1591 }
0x17a7   :  { %v986_v32 = vadd.f32 1.0, %v1592_v31 }
0x17a9   :  { %1593 = vrcp.f32 %v986_v32  ;;  %v998_v38 = vand.u32 2147483648, %v986_v32  ;;  %vm992_vm0 = vweird.f32 %v986_v32  ;;  %v996_v39 = vand.u32 2147483647, %v986_v32 }
0x17ab   :  { %v999_v41 = vor.u32 1.1754944e-38, %v998_v38  ;;  %vm997_vm3 = vcmp.eq.f32.partialorder %v996_v39, 8.507059e+37 }
0x17af   :  { %v1594_v33 = vpop.eup %1593 }
0x17b0   :  { %v988_v14 = vmul.f32 %v1594_v33, %v986_v32  ;;  %vm993_vm15 = vweird.f32 %v1594_v33 }
0x17b1   :  { %vm994_vm1 = vmor %vm992_vm0, %vm993_vm15 }
0x17b2   :  { %v989_v34 = vsub.f32 1.0, %v988_v14 }
0x17b4   :  { %v990_v35 = vmul.f32 %v1594_v33, %v989_v34 }
0x17b6   :  { %v991_v37 = vadd.f32 %v1594_v33, %v990_v35 }
0x17b8   :  { %v995_v40 = vsel %vm994_vm1, %v1594_v33, %v991_v37 }
0x17b9   :  { %v1000_v43 = vsel %vm997_vm3, %v999_v41, %v995_v40 }
0x17ba   :  { %v1006_v46 = vmul.f32 %v1004_v45, %v1000_v43 }
0x1817   :  { %v1009_v42 = vpop.permute.xlu1 %1008 }
0x1818   :  { %v1011_v44 = vmul.f32 %v1009_v42, %v1000_v43 }
0x181a   :  { %1013 = vrot.lane.b32.xlu2 %v1011_v44, %s1844_s25 }
0x1874   :  { %v1014_v47 = vpop.permute.xlu2 %1013 }
0x1875   :  { %v1016_v48 = vadd.f32 %v1014_v47, %v1006_v46 }
0x1877   :  { %1595 = vtanh.f32 %v1016_v48  ;;  %v1074_v49 = vrot.slane %v1016_v48, 7 }
0x187d   :  { %v1596_v50 = vpop.eup %1595 }
0x187e   :  { %1019 = vrot.lane.b32.xlu0 %v1596_v50, %s1843_s24 }
0x18f0   :  { %v1020_v51 = vpop.permute.xlu0 %1019 }
0x18f1   :  { %v1022_v52 = vmul.f32 %v1020_v51, %v1000_v43 }
0x18f3   :  { %v1024_v54 = vrot.slane %v1022_v52, 2  ;;  %v1374_v55 = vsel %vm175_vm4, %v1373_v53, %v1022_v52 }
0x18f5   :  { %1025 = vrot.lane.b32.xlu1 %v1024_v54, %s1844_s25 }
0x1967   :  { %v1026_v56 = vpop.permute.xlu1 %1025 }
0x1968   :  { %1482 = vmatmul.msk.f32.vlgmr.msrb.gmra.mxu0 %vm231_vm5, %v1026_v56 }
0x19e5   :  { %v1046_v57 = vpop.f32.mrf.mxu0 }
0x19e6   :  { %v1050_v58 = vrot.slane %v1046_v57, 5 }
0x19e8   :  { %v1052_v59 = vadd.f32 %v1050_v58, %v2081_v36 }
0x19ea   :  { %1597 = vtanh.f32 %v1052_v59  ;;  %v1483_v62 = vmul.f32 -1.442695, %v1052_v59 }
0x19ec   :  { %1599 = vpow2.f32 %v1483_v62 }
0x19f0   :  { %v1598_v61 = vpop.eup %1597 }
0x19f1   :  { %1078 = vrot.lane.b32.xlu2 %v1598_v61, %s1843_s24 }
0x19f2   :  { %v1600_v63 = vpop.eup %1599 }
0x19f3   :  { %v1056_v60 = vadd.f32 1.0, %v1600_v63 }
0x19f5   :  { %1601 = vrcp.f32 %v1056_v60  ;;  %v1068_v5 = vand.u32 2147483648, %v1056_v60  ;;  %vm1062_vm4 = vweird.f32 %v1056_v60  ;;  %v1066_v6 = vand.u32 2147483647, %v1056_v60 }
0x19f7   :  { %v1069_v11 = vor.u32 1.1754944e-38, %v1068_v5  ;;  %vm1067_vm9 = vcmp.eq.f32.partialorder %v1066_v6, 8.507059e+37 }
0x19fb   :  { %v1602_v0 = vpop.eup %1601 }
0x19fc   :  { %v1058_v1 = vmul.f32 %v1602_v0, %v1056_v60  ;;  %vm1063_vm2 = vweird.f32 %v1602_v0 }
0x19fd   :  { %vm1064_vm7 = vmor %vm1062_vm4, %vm1063_vm2 }
0x19fe   :  { %v1059_v2 = vsub.f32 1.0, %v1058_v1 }
0x1a00   :  { %v1060_v3 = vmul.f32 %v1602_v0, %v1059_v2 }
0x1a02   :  { %v1061_v4 = vadd.f32 %v1602_v0, %v1060_v3 }
0x1a04   :  { %v1065_v7 = vsel %vm1064_vm7, %v1602_v0, %v1061_v4 }
0x1a05   :  { %v1070_v15 = vsel %vm1067_vm9, %v1069_v11, %v1065_v7 }
0x1a06   :  { %v1076_v10 = vmul.f32 %v1074_v49, %v1070_v15 }
0x1a4b   :  { %v1079_v13 = vpop.permute.xlu2 %1078 }
0x1a4c   :  { %v1081_v16 = vmul.f32 %v1079_v13, %v1070_v15 }
0x1a4e   :  { %1083 = vrot.lane.b32.xlu0 %v1081_v16, %s1844_s25 }
0x1ac0   :  { %v1084_v17 = vpop.permute.xlu0 %1083 }
0x1ac1   :  { %v1086_v19 = vadd.f32 %v1084_v17, %v1076_v10 }
0x1ac3   :  { %1603 = vtanh.f32 %v1086_v19  ;;  %v1144_v41 = vrot.slane %v1086_v19, 7 }
0x1ac9   :  { %v1604_v20 = vpop.eup %1603 }
0x1aca   :  { %1089 = vrot.lane.b32.xlu1 %v1604_v20, %s1843_s24 }
0x1b3c   :  { %v1090_v21 = vpop.permute.xlu1 %1089 }
0x1b3d   :  { %v1092_v8 = vmul.f32 %v1090_v21, %v1070_v15 }
0x1b3f   :  { %v1094_v22 = vrot.slane %v1092_v8, 3  ;;  %v1375_v9 = vsel %vm177_vm6, %v1374_v55, %v1092_v8 }
0x1b41   :  { %1095 = vrot.lane.b32.xlu2 %v1094_v22, %s1844_s25 }
0x1b9b   :  { %v1096_v23 = vpop.permute.xlu2 %1095 }
0x1b9c   :  { %1484 = vmatmul.msk.f32.vlgmr.msra.gmra.mxu1 %vm231_vm5, %v1096_v23 }
0x1c19   :  { %v1116_v12 = vpop.f32.mrf.mxu1 }
0x1c1a   :  { %v1120_v18 = vrot.slane %v1116_v12, 4 }
0x1c1c   :  { %v1122_v24 = vadd.f32 %v1120_v18, %v2081_v36 }
0x1c1e   :  { %1605 = vtanh.f32 %v1122_v24  ;;  %v1485_v26 = vmul.f32 -1.442695, %v1122_v24 }
0x1c20   :  { %1607 = vpow2.f32 %v1485_v26 }
0x1c24   :  { %v1606_v25 = vpop.eup %1605 }
0x1c25   :  { %1148 = vrot.lane.b32.xlu0 %v1606_v25, %s1843_s24 }
0x1c26   :  { %v1608_v27 = vpop.eup %1607 }
0x1c27   :  { %v1126_v28 = vadd.f32 1.0, %v1608_v27 }
0x1c29   :  { %1609 = vrcp.f32 %v1126_v28  ;;  %v1138_v14 = vand.u32 2147483648, %v1126_v28  ;;  %vm1132_vm11 = vweird.f32 %v1126_v28  ;;  %v1136_v34 = vand.u32 2147483647, %v1126_v28 }
0x1c2b   :  { %v1139_v37 = vor.u32 1.1754944e-38, %v1138_v14  ;;  %vm1137_vm15 = vcmp.eq.f32.partialorder %v1136_v34, 8.507059e+37 }
0x1c2f   :  { %v1610_v29 = vpop.eup %1609 }
0x1c30   :  { %v1128_v30 = vmul.f32 %v1610_v29, %v1126_v28  ;;  %vm1133_vm6 = vweird.f32 %v1610_v29 }
0x1c31   :  { %vm1134_vm12 = vmor %vm1132_vm11, %vm1133_vm6 }
0x1c32   :  { %v1129_v31 = vsub.f32 1.0, %v1128_v30 }
0x1c34   :  { %v1130_v32 = vmul.f32 %v1610_v29, %v1129_v31 }
0x1c36   :  { %v1131_v33 = vadd.f32 %v1610_v29, %v1130_v32 }
0x1c38   :  { %v1135_v35 = vsel %vm1134_vm12, %v1610_v29, %v1131_v33 }
0x1c39   :  { %v1140_v39 = vsel %vm1137_vm15, %v1139_v37, %v1135_v35 }
0x1c3a   :  { %v1146_v42 = vmul.f32 %v1144_v41, %v1140_v39 }
0x1c97   :  { %v1149_v38 = vpop.permute.xlu0 %1148 }
0x1c98   :  { %v1151_v40 = vmul.f32 %v1149_v38, %v1140_v39 }
0x1c9a   :  { %1153 = vrot.lane.b32.xlu1 %v1151_v40, %s1844_s25 }
0x1d0c   :  { %v1154_v43 = vpop.permute.xlu1 %1153 }
0x1d0d   :  { %v1156_v44 = vadd.f32 %v1154_v43, %v1146_v42 }
0x1d0f   :  { %1611 = vtanh.f32 %v1156_v44  ;;  %v1214_v7 = vrot.slane %v1156_v44, 7 }
0x1d15   :  { %v1612_v45 = vpop.eup %1611 }
0x1d16   :  { %1159 = vrot.lane.b32.xlu2 %v1612_v45, %s1843_s24 }
0x1d70   :  { %v1160_v46 = vpop.permute.xlu2 %1159 }
0x1d71   :  { %v1162_v47 = vmul.f32 %v1160_v46, %v1140_v39 }
0x1d73   :  { %v1164_v48 = vrot.slane %v1162_v47, 4  ;;  %v1376_v50 = vsel %vm179_vm8, %v1375_v9, %v1162_v47 }
0x1d75   :  { %1165 = vrot.lane.b32.xlu0 %v1164_v48, %s1844_s25 }
0x1de7   :  { %v1166_v51 = vpop.permute.xlu0 %1165 }
0x1de8   :  { %1486 = vmatmul.msk.f32.vlgmr.msra.gmra.mxu2 %vm231_vm5, %v1166_v51 }
0x1e6b   :  { %v1186_v52 = vpop.f32.mrf.mxu2 }
0x1e6c   :  { %v1190_v53 = vrot.slane %v1186_v52, 3 }
0x1e6e   :  { %v1192_v54 = vadd.f32 %v1190_v53, %v2081_v36 }
0x1e70   :  { %1613 = vtanh.f32 %v1192_v54  ;;  %v1487_v56 = vmul.f32 -1.442695, %v1192_v54 }
0x1e72   :  { %1615 = vpow2.f32 %v1487_v56 }
0x1e76   :  { %v1614_v55 = vpop.eup %1613 }
0x1e77   :  { %1218 = vrot.lane.b32.xlu1 %v1614_v55, %s1843_s24 }
0x1e78   :  { %v1616_v57 = vpop.eup %1615 }
0x1e79   :  { %v1196_v58 = vadd.f32 1.0, %v1616_v57 }
0x1e7b   :  { %1617 = vrcp.f32 %v1196_v58  ;;  %v1208_v0 = vand.u32 2147483648, %v1196_v58  ;;  %vm1202_vm0 = vweird.f32 %v1196_v58  ;;  %v1206_v1 = vand.u32 2147483647, %v1196_v58 }
0x1e7d   :  { %v1209_v3 = vor.u32 1.1754944e-38, %v1208_v0  ;;  %vm1207_vm3 = vcmp.eq.f32.partialorder %v1206_v1, 8.507059e+37 }
0x1e81   :  { %v1618_v59 = vpop.eup %1617 }
0x1e82   :  { %v1198_v61 = vmul.f32 %v1618_v59, %v1196_v58  ;;  %vm1203_vm8 = vweird.f32 %v1618_v59 }
0x1e83   :  { %vm1204_vm1 = vmor %vm1202_vm0, %vm1203_vm8 }
0x1e84   :  { %v1199_v62 = vsub.f32 1.0, %v1198_v61 }
0x1e86   :  { %v1200_v63 = vmul.f32 %v1618_v59, %v1199_v62 }
0x1e88   :  { %v1201_v60 = vadd.f32 %v1618_v59, %v1200_v63 }
0x1e8a   :  { %v1205_v2 = vsel %vm1204_vm1, %v1618_v59, %v1201_v60 }
0x1e8b   :  { %v1210_v5 = vsel %vm1207_vm3, %v1209_v3, %v1205_v2 }
0x1e8c   :  { %v1216_v11 = vmul.f32 %v1214_v7, %v1210_v5  ;;  %v1382_v7 = vld [vmem:[#allocation13 + $0x10] sm:$0xff] }
0x1ee9   :  { %v1219_v4 = vpop.permute.xlu1 %1218 }
0x1eea   :  { %v1221_v6 = vmul.f32 %v1219_v4, %v1210_v5 }
0x1eec   :  { %1223 = vrot.lane.b32.xlu2 %v1221_v6, %s1844_s25  ;;  %v1383_v6 = vld [vmem:[#allocation13 + $0x18] sm:$0xff] }
0x1eed   :  { %1405 = vmatpush.msrb.mxu1 %v1383_v6 }
0x1eef   :  { %1406 = vmatpush.msrb.mxu1 %v1382_v7 }
0x1f46   :  { %v1224_v13 = vpop.permute.xlu2 %1223 }
0x1f47   :  { %v1226_v15 = vadd.f32 %v1224_v13, %v1216_v11  ;;  %v1381_v11 = vld [vmem:[#allocation13 + $0x8] sm:$0xff]  ;;  %v1380_v13 = vld [vmem:[#allocation13] sm:$0xff] }
0x1f48   :  { %1407 = vmatpush.msrb.mxu1 %v1381_v11 }
0x1f49   :  { %1619 = vtanh.f32 %v1226_v15  ;;  %v1284_v35 = vrot.slane %v1226_v15, 7 }
0x1f4a   :  { %1408 = vmatpush.msrb.mxu1 %v1380_v13 }
0x1f4f   :  { %v1620_v16 = vpop.eup %1619 }
0x1f50   :  { %1229 = vrot.lane.b32.xlu0 %v1620_v16, %s1843_s24 }
0x1fc2   :  { %v1230_v49 = vpop.permute.xlu0 %1229 }
0x1fc3   :  { %v1232_v10 = vmul.f32 %v1230_v49, %v1210_v5 }
0x1fc5   :  { %v1234_v17 = vrot.slane %v1232_v10, 5  ;;  %v1377_v19 = vsel %vm181_vm10, %v1376_v50, %v1232_v10 }
0x1fc7   :  { %1235 = vrot.lane.b32.xlu1 %v1234_v17, %s1844_s25  ;;  %v1508_v17 = vld [vmem:[%s2156_s8] ss:$0 sm:$0xff]  ;;  %s1433_s8 = sshll.u32 %s2157_s9, 4  ;;  %s1434_s8 = int_to_ptr.hbm [resolvable:$true] %s1433_s8 }
0x2039   :  { %v1236_v20 = vpop.permute.xlu1 %1235 }
0x203a   :  { %1488 = vmatmul.msk.f32.vlgmr.msra.gmra.mxu3 %vm231_vm5, %v1236_v20 }
0x20bd   :  { %v1256_v21 = vpop.f32.mrf.mxu3 }
0x20be   :  { %v1260_v8 = vrot.slane %v1256_v21, 2 }
0x20c0   :  { %v1262_v22 = vadd.f32 %v1260_v8, %v2081_v36 }
0x20c2   :  { %1621 = vtanh.f32 %v1262_v22  ;;  %v1489_v23 = vmul.f32 -1.442695, %v1262_v22 }
0x20c4   :  { %1623 = vpow2.f32 %v1489_v23 }
0x20c8   :  { %v1622_v9 = vpop.eup %1621 }
0x20c9   :  { %1288 = vrot.lane.b32.xlu2 %v1622_v9, %s1843_s24 }
0x20ca   :  { %v1624_v12 = vpop.eup %1623 }
0x20cb   :  { %v1266_v18 = vadd.f32 1.0, %v1624_v12 }
0x20cd   :  { %1625 = vrcp.f32 %v1266_v18  ;;  %v1278_v29 = vand.u32 2147483648, %v1266_v18  ;;  %vm1272_vm2 = vweird.f32 %v1266_v18  ;;  %v1276_v30 = vand.u32 2147483647, %v1266_v18 }
0x20cf   :  { %v1279_v32 = vor.u32 1.1754944e-38, %v1278_v29  ;;  %vm1277_vm7 = vcmp.eq.f32.partialorder %v1276_v30, 8.507059e+37 }
0x20d3   :  { %v1626_v24 = vpop.eup %1625 }
0x20d4   :  { %v1268_v25 = vmul.f32 %v1626_v24, %v1266_v18  ;;  %vm1273_vm10 = vweird.f32 %v1626_v24 }
0x20d5   :  { %vm1274_vm4 = vmor %vm1272_vm2, %vm1273_vm10 }
0x20d6   :  { %v1269_v26 = vsub.f32 1.0, %v1268_v25 }
0x20d8   :  { %v1270_v27 = vmul.f32 %v1626_v24, %v1269_v26 }
0x20da   :  { %v1271_v28 = vadd.f32 %v1626_v24, %v1270_v27 }
0x20dc   :  { %v1275_v31 = vsel %vm1274_vm4, %v1626_v24, %v1271_v28 }
0x20dd   :  { %v1280_v14 = vsel %vm1277_vm7, %v1279_v32, %v1275_v31 }
0x20de   :  { %v1286_v37 = vmul.f32 %v1284_v35, %v1280_v14 }
0x2123   :  { %v1289_v33 = vpop.permute.xlu2 %1288 }
0x2124   :  { %v1291_v34 = vmul.f32 %v1289_v33, %v1280_v14 }
0x2126   :  { %1293 = vrot.lane.b32.xlu0 %v1291_v34, %s1844_s25 }
0x2198   :  { %v1294_v38 = vpop.permute.xlu0 %1293 }
0x2199   :  { %v1296_v39 = vadd.f32 %v1294_v38, %v1286_v37 }
0x219b   :  { %1627 = vtanh.f32 %v1296_v39  ;;  %v1354_v1 = vrot.slane %v1296_v39, 7 }
0x21a1   :  { %v1628_v40 = vpop.eup %1627 }
0x21a2   :  { %1299 = vrot.lane.b32.xlu1 %v1628_v40, %s1843_s24 }
0x2214   :  { %v1300_v41 = vpop.permute.xlu1 %1299 }
0x2215   :  { %v1302_v42 = vmul.f32 %v1300_v41, %v1280_v14 }
0x2217   :  { %v1304_v43 = vrot.slane %v1302_v42, 6  ;;  %v1378_v44 = vsel %vm183_vm13, %v1377_v19, %v1302_v42 }
0x2219   :  { %1305 = vrot.lane.b32.xlu2 %v1304_v43, %s1844_s25 }
0x2273   :  { %v1306_v45 = vpop.permute.xlu2 %1305 }
0x2274   :  { %1490 = vmatmul.msk.f32.vlgmr.msra.gmra.mxu0 %vm231_vm5, %v1306_v45 }
0x22f1   :  { %v1326_v46 = vpop.f32.mrf.mxu0 }
0x22f2   :  { %v1330_v47 = vrot.slane %v1326_v46, 1 }
0x22f4   :  { %v1332_v48 = vadd.f32 %v1330_v47, %v2081_v36 }
0x22f6   :  { %1629 = vtanh.f32 %v1332_v48  ;;  %v1491_v51 = vmul.f32 -1.442695, %v1332_v48 }
0x22f8   :  { %1631 = vpow2.f32 %v1491_v51 }
0x22fc   :  { %v1630_v50 = vpop.eup %1629 }
0x22fd   :  { %1358 = vrot.lane.b32.xlu0 %v1630_v50, %s1843_s24 }
0x22fe   :  { %v1632_v52 = vpop.eup %1631 }
0x22ff   :  { %v1336_v53 = vadd.f32 1.0, %v1632_v52 }
0x2301   :  { %1633 = vrcp.f32 %v1336_v53  ;;  %v1348_v59 = vand.u32 2147483648, %v1336_v53  ;;  %vm1342_vm9 = vweird.f32 %v1336_v53  ;;  %v1346_v61 = vand.u32 2147483647, %v1336_v53 }
0x2303   :  { %v1349_v62 = vor.u32 1.1754944e-38, %v1348_v59  ;;  %vm1347_vm11 = vcmp.eq.f32.partialorder %v1346_v61, 8.507059e+37 }
0x2307   :  { %v1634_v54 = vpop.eup %1633 }
0x2308   :  { %v1338_v55 = vmul.f32 %v1634_v54, %v1336_v53  ;;  %vm1343_vm13 = vweird.f32 %v1634_v54 }
0x2309   :  { %vm1344_vm6 = vmor %vm1342_vm9, %vm1343_vm13 }
0x230a   :  { %v1339_v56 = vsub.f32 1.0, %v1338_v55 }
0x230c   :  { %v1340_v57 = vmul.f32 %v1634_v54, %v1339_v56 }
0x230e   :  { %v1341_v58 = vadd.f32 %v1634_v54, %v1340_v57 }
0x2310   :  { %v1345_v36 = vsel %vm1344_vm6, %v1634_v54, %v1341_v58 }
0x2311   :  { %v1350_v60 = vsel %vm1347_vm11, %v1349_v62, %v1345_v36 }
0x2312   :  { %v1356_v2 = vmul.f32 %v1354_v1, %v1350_v60 }
0x236f   :  { %v1359_v63 = vpop.permute.xlu0 %1358 }
0x2370   :  { %v1361_v0 = vmul.f32 %v1359_v63, %v1350_v60 }
0x2372   :  { %1363 = vrot.lane.b32.xlu1 %v1361_v0, %s1844_s25 }
0x23e4   :  { %v1364_v3 = vpop.permute.xlu1 %1363 }
0x23e5   :  { %v1366_v4 = vadd.f32 %v1364_v3, %v1356_v2 }
0x23e7   :  { %1635 = vtanh.f32 %v1366_v4 }
0x23ed   :  { %v1636_v5 = vpop.eup %1635 }
0x23ee   :  { %1369 = vrot.lane.b32.xlu2 %v1636_v5, %s1843_s24 }
0x2448   :  { %v1370_v15 = vpop.permute.xlu2 %1369 }
0x2449   :  { %v1372_v16 = vmul.f32 %v1370_v15, %v1350_v60 }
0x244b   :  { %v1379_v49 = vsel %vm185_vm14, %v1378_v44, %v1372_v16 }
0x244c   :  { %1389 = vrot.lane.b32.xlu0 %v1379_v49, %s1844_s25 }
0x24be   :  { %v1390_v10 = vpop.permute.xlu0 %1389 }
0x24bf   :  { %1492 = vmatmul.msk.f32.vlgmr.msrb.gmra.mxu1 %vm231_vm5, %v1390_v10 }
0x253c   :  { %v1410_v19 = vpop.f32.mrf.mxu1 }
0x253d   :  { %v1411_v20 = vadd.f32 %v1508_v17, %v1410_v19 }
0x253f   :  { %v1413_v21 = vmax.f32 %v1411_v20, 0.0 }
0x2541   :  { %1414 = vmax.xlane.f32.xlu1 %v1413_v21 }
0x25b4   :  { %v1415_v8 = vpop.xlane.xlu1 %1414 }
0x25b5   :  { %v1416_v22 = vsub.f32 %v1413_v21, %v1415_v8 }
0x25b7   :  { %v1417_v9 = vmul.f32 1.442695, %v1416_v22 }
0x25b9   :  { %1637 = vpow2.f32 %v1417_v9 }
0x25bf   :  { %v1638_v23 = vpop.eup %1637 }
0x25c0   :  { %1419 = vadd.xlane.f32.xlu2 %v1638_v23 }
0x2633   :  { %v1420_v12 = vpop.xlane.xlu2 %1419 }
0x2634   :  { %1639 = vlog2.f32 %v1420_v12 }
0x263a   :  { %v1640_v18 = vpop.eup %1639 }
0x263b   :  { %v1422_v24 = vmul.f32 0.6931472, %v1640_v18 }
0x263d   :  { %v1423_v25 = vadd.f32 %v1422_v24, %v1415_v8 }
0x263f   :  { %v1424_v26 = vsub.f32 %v1413_v21, %v1423_v25 }
0x2641   :  { %1425 = vst [vmem:[#allocation15] sm:$0xff] %v1424_v26 }
0x2642   :  { %1436 = dma.vmem_to_hbm [thread:$0]  %s1432_s28, 128, %s1434_s8, [#allocation6]  }
0x2643   :  { %1831 = dma.done.wait [#allocation6], 128  }
0x2644   :  { %1832 = vsyncadd [#allocation6], 4294967168 }
0x2645   :  { %1441 = vsyncpa [#allocation5], 1 }
0x2646   :  { %1442 = vsyncpa [#allocation8], 1 }
0x2647   :  { %1443 = vsyncpa [#allocation11], 1 }
0x2648   :  { %1444 = vsyncpa [#allocation14], 1 }
0x2649   :  { %1445 = vsyncpa [#allocation6], 1 }

</bundles_post_ra>
